<compile_context>
chip_gen: v7x
topology: tpu7x:2x2x1
jax: 0.10.0
libtpu: 0.0.40
codegen_flags: <defaults>
</compile_context>

<pallas_src>
import math

import jax
import jax.numpy as jnp
from jax.experimental import pallas as pl
from jax.experimental.pallas import tpu as pltpu

# --- small synthetic ALBERT config ------------------------------------------
BATCH = 2
SEQ = 8
HIDDEN = 32
INTERMEDIATE = 64
NUM_HEADS = 4
HEAD_DIM = HIDDEN // NUM_HEADS
LN_EPS = 1e-12

# Lane-dense output width (and slab lane width): one full vreg lane extent.
OUT_PAD = 128

# Packed weight-slab row offsets (all multiples of 8 -> sublane aligned).
W_QKV_R0 = 0
W_O_R0 = W_QKV_R0 + HIDDEN
W_F1_R0 = W_O_R0 + HIDDEN
W_F2_R0 = W_F1_R0 + HIDDEN
W_ROWS = W_F2_R0 + INTERMEDIATE          # 160 rows x 128 lanes, f32 (80 KiB)

# Packed bias / LayerNorm vector slab rows (one (8,128) f32 tile total).
V_BQKV, V_BO, V_LNA_W, V_LNA_B, V_B1, V_B2, V_LNF_W, V_LNF_B = range(8)

# MXU operand dtype. Flip to jnp.bfloat16 on v6e/v7x at real model shapes
# (accumulation stays f32 via preferred_element_type); kept f32 here so the
# 2e-3 check against the f32 reference is robust and v5e avoids bf16 converts.
MATMUL_DTYPE = jnp.float32


# --- helpers used inside the kernel (pure jnp, trace into Mosaic) ------------
def _layer_norm(x, w, b, eps):
    mu = jnp.mean(x, axis=-1, keepdims=True)
    var = jnp.mean((x - mu) ** 2, axis=-1, keepdims=True)
    return (x - mu) * jax.lax.rsqrt(var + eps) * w + b


def _new_gelu(x):
    # x*x*x (two free VPU multiplies) instead of jnp.power(x, 3.0), which
    # would lower through exp/log on the single EUP slot already used by tanh.
    c = math.sqrt(2.0 / math.pi)
    return 0.5 * x * (1.0 + jnp.tanh(c * (x + 0.044715 * (x * x * x))))


# --- the Pallas kernel --------------------------------------------------------
def albert_layer_kernel(
    x_ref,                                    # [B*S, H]
    w_ref,                                    # [W_ROWS, 128] packed weights
    vec_ref,                                  # [8, 128] packed biases/LN params
    out_ref,                                  # [B*S, 128]   (lane-dense)
    probs_ref,                                # [B*NH*S, 128] (lane-dense)
):
    H, H3, I = HIDDEN, 3 * HIDDEN, INTERMEDIATE
    x = x_ref[...]                            # whole slab, batch folded into rows

    # --- static slices of the packed parameter slabs (no extra DMAs) --------
    wqkv = w_ref[W_QKV_R0:W_QKV_R0 + H, 0:H3].astype(MATMUL_DTYPE)   # [H, 3H]
    wo   = w_ref[W_O_R0:W_O_R0 + H, 0:H].astype(MATMUL_DTYPE)        # [H, H]
    w1   = w_ref[W_F1_R0:W_F1_R0 + H, 0:I].astype(MATMUL_DTYPE)      # [H, I]
    w2   = w_ref[W_F2_R0:W_F2_R0 + I, 0:H].astype(MATMUL_DTYPE)      # [I, H]

    bqkv   = vec_ref[V_BQKV:V_BQKV + 1, 0:H3]
    bo     = vec_ref[V_BO:V_BO + 1, 0:H]
    ln_a_w = vec_ref[V_LNA_W:V_LNA_W + 1, 0:H]
    ln_a_b = vec_ref[V_LNA_B:V_LNA_B + 1, 0:H]
    b1     = vec_ref[V_B1:V_B1 + 1, 0:I]
    b2     = vec_ref[V_B2:V_B2 + 1, 0:H]
    ln_f_w = vec_ref[V_LNF_W:V_LNF_W + 1, 0:H]
    ln_f_b = vec_ref[V_LNF_B:V_LNF_B + 1, 0:H]

    # --- fused QKV projection: one MXU push for all of Q, K, V ---------------
    # (1/sqrt(head_dim) is already folded into the Q columns in prepare_params)
    qkv = jnp.dot(x.astype(MATMUL_DTYPE), wqkv,
                  preferred_element_type=jnp.float32) + bqkv          # [B*S, 3H]
    q = qkv[:, 0:H]
    k = qkv[:, H:2 * H]
    v = qkv[:, 2 * H:3 * H]

    # --- per-(batch, head) attention; contexts stay in vregs -----------------
    prob_tiles = []        # (b, h)-ordered [S, S] attention probabilities
    ctx_rows = []          # per-batch [S, H] lane-concatenated head contexts
    for b in range(BATCH):
        r0 = b * SEQ
        head_ctx = []
        for h in range(NUM_HEADS):
            c0 = h * HEAD_DIM
            qh = q[r0:r0 + SEQ, c0:c0 + HEAD_DIM]
            kh = k[r0:r0 + SEQ, c0:c0 + HEAD_DIM]
            vh = v[r0:r0 + SEQ, c0:c0 + HEAD_DIM]
            # scores = qh @ kh^T (contract on last dims; no explicit transpose)
            s = jax.lax.dot_general(
                qh, kh, dimension_numbers=(((1,), (1,)), ((), ())),
                preferred_element_type=jnp.float32)
            s = s - jnp.max(s, axis=-1, keepdims=True)
            e = jnp.exp(s)
            # exact reciprocal: probs are a returned output (review concern)
            p = e * pl.reciprocal(jnp.sum(e, axis=-1, keepdims=True),
                                  approx=False)
            prob_tiles.append(p)
            head_ctx.append(jnp.dot(p.astype(MATMUL_DTYPE),
                                    vh.astype(MATMUL_DTYPE),
                                    preferred_element_type=jnp.float32))
        ctx_rows.append(jnp.concatenate(head_ctx, axis=1))            # [S, H]
    ctx = jnp.concatenate(ctx_rows, axis=0)                           # [B*S, H]

    # --- single Wo projection for all batches/heads + residual LayerNorm -----
    attn_dense = jnp.dot(ctx.astype(MATMUL_DTYPE), wo,
                         preferred_element_type=jnp.float32) + bo     # [B*S, H]
    attn_out = _layer_norm(attn_dense + x, ln_a_w, ln_a_b, LN_EPS)

    # --- FFN: Linear -> NewGELU -> Linear, then full-layer residual LN -------
    ffn_h = _new_gelu(jnp.dot(attn_out.astype(MATMUL_DTYPE), w1,
                              preferred_element_type=jnp.float32) + b1)
    ffn_out = jnp.dot(ffn_h.astype(MATMUL_DTYPE), w2,
                      preferred_element_type=jnp.float32) + b2
    y = _layer_norm(ffn_out + attn_out, ln_f_w, ln_f_b, LN_EPS)

    # --- lane-dense (128-wide) unmasked stores; wrapper slices them back -----
    out_ref[...] = jnp.concatenate(
        [y, jnp.zeros((BATCH * SEQ, OUT_PAD - HIDDEN), jnp.float32)], axis=1)
    probs_stack = jnp.concatenate(prob_tiles, axis=0)                 # [B*NH*S, S]
    probs_ref[...] = jnp.concatenate(
        [probs_stack,
         jnp.zeros((BATCH * NUM_HEADS * SEQ, OUT_PAD - SEQ), jnp.float32)],
        axis=1)


# --- wrapper ------------------------------------------------------------------
def prepare_params(params):
    """One-time parameter glue, hoisted off the forward path.

    PyTorch Linear stores W as [out, in]; pre-transpose to [in, out], fuse
    Q|K|V, fold 1/sqrt(head_dim) into the Q columns, and pack everything into
    two lane-dense slabs: one [W_ROWS, 128] weight slab and one [8, 128]
    bias / LayerNorm vector slab."""
    scale = 1.0 / math.sqrt(HEAD_DIM)

    def t(w):
        return jnp.asarray(w, jnp.float32).T          # [in, out]

    wqkv = jnp.concatenate([t(params["wq"]) * scale, t(params["wk"]),
                            t(params["wv"])], axis=1)                 # [H, 3H]
    bqkv = jnp.concatenate([jnp.asarray(params["bq"], jnp.float32) * scale,
                            jnp.asarray(params["bk"], jnp.float32),
                            jnp.asarray(params["bv"], jnp.float32)])  # [3H]

    def pad_cols(w):
        w = jnp.asarray(w, jnp.float32)
        return jnp.pad(w, ((0, 0), (0, OUT_PAD - w.shape[1])))

    w_slab = jnp.concatenate(
        [pad_cols(wqkv), pad_cols(t(params["wo"])),
         pad_cols(t(params["ffn_w"])), pad_cols(t(params["ffn_out_w"]))],
        axis=0)                                                        # [160, 128]
    assert w_slab.shape == (W_ROWS, OUT_PAD)

    def row(v):
        v = jnp.asarray(v, jnp.float32).reshape(-1)
        return jnp.pad(v, (0, OUT_PAD - v.shape[0])).reshape(1, OUT_PAD)

    vec_slab = jnp.concatenate(
        [row(bqkv), row(params["bo"]),
         row(params["ln_attn_w"]), row(params["ln_attn_b"]),
         row(params["ffn_b"]), row(params["ffn_out_b"]),
         row(params["ln_full_w"]), row(params["ln_full_b"])], axis=0)  # [8, 128]

    return w_slab, vec_slab


def _full_spec(shape):
    zeros = (0,) * len(shape)
    return pl.BlockSpec(shape, lambda i, _z=zeros: _z)


@jax.jit
def albert_layer_group_forward(hidden_states, w_slab, vec_slab):
    B, S, H = hidden_states.shape
    assert (B, S, H) == (BATCH, SEQ, HIDDEN)

    # Fold batch into the matmul row dimension (free row-major reshape).
    x2 = hidden_states.astype(jnp.float32).reshape(B * S, H)

    out_shape = (
        jax.ShapeDtypeStruct((B * S, OUT_PAD), jnp.float32),
        jax.ShapeDtypeStruct((B * NUM_HEADS * S, OUT_PAD), jnp.float32),
    )

    out2, probs2 = pl.pallas_call(
        albert_layer_kernel,
        out_shape=out_shape,
        grid=(1,),  # whole problem is one VMEM-resident tile -> single step
        in_specs=[_full_spec(x2.shape),
                  _full_spec(w_slab.shape),
                  _full_spec(vec_slab.shape)],
        out_specs=(
            _full_spec((B * S, OUT_PAD)),
            _full_spec((B * NUM_HEADS * S, OUT_PAD)),
        ),
        compiler_params=pltpu.CompilerParams(
            dimension_semantics=("arbitrary",)),
    )(x2, w_slab, vec_slab)

    # Slice off the lane padding and restore the module's output layout
    # (XLA-side, outside the kernel's hot path).
    out = out2[:, :H].reshape(B, S, H)
    probs = probs2[:, :S].reshape(B, NUM_HEADS, S, S)
    return out, probs


# --- pure-JAX reference (for a sanity check) ----------------------------------
def reference_forward(x, p):
    B, S, H = x.shape

    def lin(t, w, b):  # w in PyTorch [out, in] layout
        return jnp.einsum("bsh,oh->bso", t, w) + b

    def split_heads(t):
        return t.reshape(B, S, NUM_HEADS, HEAD_DIM).transpose(0, 2, 1, 3)

    q = split_heads(lin(x, p["wq"], p["bq"]))
    k = split_heads(lin(x, p["wk"], p["bk"]))
    v = split_heads(lin(x, p["wv"], p["bv"]))
    scores = jnp.einsum("bhqd,bhkd->bhqk", q, k) / math.sqrt(HEAD_DIM)
    probs = jax.nn.softmax(scores, axis=-1)
    ctx = jnp.einsum("bhqk,bhkd->bhqd", probs, v).transpose(0, 2, 1, 3).reshape(B, S, H)
    attn_dense = lin(ctx, p["wo"], p["bo"])
    attn_out = _layer_norm(attn_dense + x, p["ln_attn_w"], p["ln_attn_b"], LN_EPS)
    ffn = _new_gelu(lin(attn_out, p["ffn_w"], p["ffn_b"]))
    ffn_out = lin(ffn, p["ffn_out_w"], p["ffn_out_b"])
    out = _layer_norm(ffn_out + attn_out, p["ln_full_w"], p["ln_full_b"], LN_EPS)
    return out, probs


# --- deterministic parameter init ---------------------------------------------
def init_params(key):
    keys = jax.random.split(key, 8)
    std = 0.02
    return {
        "wq": std * jax.random.normal(keys[0], (HIDDEN, HIDDEN), jnp.float32),
        "bq": jnp.zeros((HIDDEN,), jnp.float32),
        "wk": std * jax.random.normal(keys[1], (HIDDEN, HIDDEN), jnp.float32),
        "bk": jnp.zeros((HIDDEN,), jnp.float32),
        "wv": std * jax.random.normal(keys[2], (HIDDEN, HIDDEN), jnp.float32),
        "bv": jnp.zeros((HIDDEN,), jnp.float32),
        "wo": std * jax.random.normal(keys[3], (HIDDEN, HIDDEN), jnp.float32),
        "bo": jnp.zeros((HIDDEN,), jnp.float32),
        "ln_attn_w": jnp.ones((HIDDEN,), jnp.float32),
        "ln_attn_b": jnp.zeros((HIDDEN,), jnp.float32),
        "ffn_w": std * jax.random.normal(keys[4], (INTERMEDIATE, HIDDEN), jnp.float32),
        "ffn_b": jnp.zeros((INTERMEDIATE,), jnp.float32),
        "ffn_out_w": std * jax.random.normal(keys[5], (HIDDEN, INTERMEDIATE), jnp.float32),
        "ffn_out_b": jnp.zeros((HIDDEN,), jnp.float32),
        "ln_full_w": jnp.ones((HIDDEN,), jnp.float32),
        "ln_full_b": jnp.zeros((HIDDEN,), jnp.float32),
    }


if __name__ == "__main__":
    key = jax.random.PRNGKey(0)
    k_x, k_p = jax.random.split(key)
    x = jax.random.normal(k_x, (BATCH, SEQ, HIDDEN), jnp.float32)
    params = init_params(k_p)

    w_slab, vec_slab = prepare_params(params)  # one-time glue, off the hot path

    hidden_out, attn_probs = albert_layer_group_forward(x, w_slab, vec_slab)
    hidden_out = jax.block_until_ready(hidden_out)
    attn_probs = jax.block_until_ready(attn_probs)

    ref_out, ref_probs = reference_forward(x, params)
    assert hidden_out.shape == (BATCH, SEQ, HIDDEN)
    assert attn_probs.shape == (BATCH, NUM_HEADS, SEQ, SEQ)
    assert jnp.allclose(hidden_out, ref_out, rtol=2e-3, atol=2e-3)
    assert jnp.allclose(attn_probs, ref_probs, rtol=2e-3, atol=2e-3)

    print("KERNEL_OK")
</pallas_src>

<mosaic_0001>
module attributes {stable_mosaic.version = 11 : i64} {
  func.func @albert_layer_kernel(%arg0: i32, %arg1: memref<16x32xf32, #tpu.memory_space<vmem>>, %arg2: memref<160x128xf32, #tpu.memory_space<vmem>>, %arg3: memref<8x128xf32, #tpu.memory_space<vmem>>, %arg4: memref<16x128xf32, #tpu.memory_space<vmem>>, %arg5: memref<64x128xf32, #tpu.memory_space<vmem>>) attributes {dimension_semantics = [#tpu.dimension_semantics<arbitrary>], iteration_bounds = array<i64: 1>, scalar_prefetch = 0 : i64, scratch_operands = 0 : i64, tpu.core_type = #tpu.core_type<tc>, window_params = [{pipeline_mode = #tpu.pipeline_mode<synchronous>, transform_indices = @transform_0, window_bounds = array<i64: 16, 32>}, {pipeline_mode = #tpu.pipeline_mode<synchronous>, transform_indices = @transform_1, window_bounds = array<i64: 160, 128>}, {pipeline_mode = #tpu.pipeline_mode<synchronous>, transform_indices = @transform_2, window_bounds = array<i64: 8, 128>}, {pipeline_mode = #tpu.pipeline_mode<synchronous>, transform_indices = @transform_3, window_bounds = array<i64: 16, 128>}, {pipeline_mode = #tpu.pipeline_mode<synchronous>, transform_indices = @transform_4, window_bounds = array<i64: 64, 128>}]} {
    %c0 = arith.constant 0 : index
    %c0_0 = arith.constant 0 : index
    %0 = vector.load %arg1[%c0, %c0_0] : memref<16x32xf32, #tpu.memory_space<vmem>>, vector<16x32xf32>
    %c0_1 = arith.constant 0 : index
    %c0_2 = arith.constant 0 : index
    %1 = vector.load %arg2[%c0_1, %c0_2] : memref<160x128xf32, #tpu.memory_space<vmem>>, vector<32x96xf32>
    %c32 = arith.constant 32 : index
    %c0_3 = arith.constant 0 : index
    %2 = vector.load %arg2[%c32, %c0_3] : memref<160x128xf32, #tpu.memory_space<vmem>>, vector<32x32xf32>
    %c64 = arith.constant 64 : index
    %c0_4 = arith.constant 0 : index
    %3 = vector.load %arg2[%c64, %c0_4] : memref<160x128xf32, #tpu.memory_space<vmem>>, vector<32x64xf32>
    %c96 = arith.constant 96 : index
    %c0_5 = arith.constant 0 : index
    %4 = vector.load %arg2[%c96, %c0_5] : memref<160x128xf32, #tpu.memory_space<vmem>>, vector<64x32xf32>
    %c0_6 = arith.constant 0 : index
    %c0_7 = arith.constant 0 : index
    %5 = vector.load %arg3[%c0_6, %c0_7] : memref<8x128xf32, #tpu.memory_space<vmem>>, vector<1x96xf32>
    %c1 = arith.constant 1 : index
    %c0_8 = arith.constant 0 : index
    %6 = vector.load %arg3[%c1, %c0_8] : memref<8x128xf32, #tpu.memory_space<vmem>>, vector<1x32xf32>
    %c2 = arith.constant 2 : index
    %c0_9 = arith.constant 0 : index
    %7 = vector.load %arg3[%c2, %c0_9] : memref<8x128xf32, #tpu.memory_space<vmem>>, vector<1x32xf32>
    %c3 = arith.constant 3 : index
    %c0_10 = arith.constant 0 : index
    %8 = vector.load %arg3[%c3, %c0_10] : memref<8x128xf32, #tpu.memory_space<vmem>>, vector<1x32xf32>
    %c4 = arith.constant 4 : index
    %c0_11 = arith.constant 0 : index
    %9 = vector.load %arg3[%c4, %c0_11] : memref<8x128xf32, #tpu.memory_space<vmem>>, vector<1x64xf32>
    %c5 = arith.constant 5 : index
    %c0_12 = arith.constant 0 : index
    %10 = vector.load %arg3[%c5, %c0_12] : memref<8x128xf32, #tpu.memory_space<vmem>>, vector<1x32xf32>
    %c6 = arith.constant 6 : index
    %c0_13 = arith.constant 0 : index
    %11 = vector.load %arg3[%c6, %c0_13] : memref<8x128xf32, #tpu.memory_space<vmem>>, vector<1x32xf32>
    %c7 = arith.constant 7 : index
    %c0_14 = arith.constant 0 : index
    %12 = vector.load %arg3[%c7, %c0_14] : memref<8x128xf32, #tpu.memory_space<vmem>>, vector<1x32xf32>
    %cst = arith.constant dense<0.000000e+00> : vector<16x96xf32>
    %13 = tpu.matmul %0, %1, %cst {dimension_numbers = #tpu.dot_dimension_numbers<[1], [0], [0], [1], [0, 0, 1, 1], [], []>} : vector<16x32xf32>, vector<32x96xf32>, vector<16x96xf32> -> vector<16x96xf32>
    %14 = vector.broadcast %5 : vector<1x96xf32> to vector<16x96xf32>
    %15 = arith.addf %13, %14 : vector<16x96xf32>
    %16 = vector.extract_strided_slice %15 {offsets = [0, 0], sizes = [16, 32], strides = [1, 1]} : vector<16x96xf32> to vector<16x32xf32>
    %17 = vector.extract_strided_slice %15 {offsets = [0, 32], sizes = [16, 32], strides = [1, 1]} : vector<16x96xf32> to vector<16x32xf32>
    %18 = vector.extract_strided_slice %15 {offsets = [0, 64], sizes = [16, 32], strides = [1, 1]} : vector<16x96xf32> to vector<16x32xf32>
    %19 = vector.extract_strided_slice %16 {offsets = [0, 0], sizes = [8, 8], strides = [1, 1]} : vector<16x32xf32> to vector<8x8xf32>
    %20 = vector.extract_strided_slice %17 {offsets = [0, 0], sizes = [8, 8], strides = [1, 1]} : vector<16x32xf32> to vector<8x8xf32>
    %21 = vector.extract_strided_slice %18 {offsets = [0, 0], sizes = [8, 8], strides = [1, 1]} : vector<16x32xf32> to vector<8x8xf32>
    %cst_15 = arith.constant dense<0.000000e+00> : vector<8x8xf32>
    %22 = tpu.matmul %19, %20, %cst_15 {dimension_numbers = #tpu.dot_dimension_numbers<[1], [1], [0], [0], [0, 0, 1, 0], [], []>} : vector<8x8xf32>, vector<8x8xf32>, vector<8x8xf32> -> vector<8x8xf32>
    %cst_16 = arith.constant dense<0xFF800000> : vector<8xf32>
    %23 = vector.multi_reduction <maximumf>, %22, %cst_16 [1] : vector<8x8xf32> to vector<8xf32>
    %24 = vector.shape_cast %23 : vector<8xf32> to vector<8x1xf32>
    %25 = vector.broadcast %24 : vector<8x1xf32> to vector<8x8xf32>
    %26 = arith.subf %22, %25 : vector<8x8xf32>
    %27 = math.exp %26 : vector<8x8xf32>
    %cst_17 = arith.constant dense<0.000000e+00> : vector<8xf32>
    %28 = vector.multi_reduction <add>, %27, %cst_17 [1] : vector<8x8xf32> to vector<8xf32>
    %29 = vector.shape_cast %28 : vector<8xf32> to vector<8x1xf32>
    %30 = tpu.reciprocal %29 : vector<8x1xf32> -> vector<8x1xf32>
    %31 = vector.broadcast %30 : vector<8x1xf32> to vector<8x8xf32>
    %32 = arith.mulf %27, %31 : vector<8x8xf32>
    %cst_18 = arith.constant dense<0.000000e+00> : vector<8x8xf32>
    %33 = tpu.matmul %32, %21, %cst_18 {dimension_numbers = #tpu.dot_dimension_numbers<[1], [0], [0], [1], [0, 0, 1, 1], [], []>} : vector<8x8xf32>, vector<8x8xf32>, vector<8x8xf32> -> vector<8x8xf32>
    %34 = vector.extract_strided_slice %16 {offsets = [0, 8], sizes = [8, 8], strides = [1, 1]} : vector<16x32xf32> to vector<8x8xf32>
    %35 = vector.extract_strided_slice %17 {offsets = [0, 8], sizes = [8, 8], strides = [1, 1]} : vector<16x32xf32> to vector<8x8xf32>
    %36 = vector.extract_strided_slice %18 {offsets = [0, 8], sizes = [8, 8], strides = [1, 1]} : vector<16x32xf32> to vector<8x8xf32>
    %cst_19 = arith.constant dense<0.000000e+00> : vector<8x8xf32>
    %37 = tpu.matmul %34, %35, %cst_19 {dimension_numbers = #tpu.dot_dimension_numbers<[1], [1], [0], [0], [0, 0, 1, 0], [], []>} : vector<8x8xf32>, vector<8x8xf32>, vector<8x8xf32> -> vector<8x8xf32>
    %cst_20 = arith.constant dense<0xFF800000> : vector<8xf32>
    %38 = vector.multi_reduction <maximumf>, %37, %cst_20 [1] : vector<8x8xf32> to vector<8xf32>
    %39 = vector.shape_cast %38 : vector<8xf32> to vector<8x1xf32>
    %40 = vector.broadcast %39 : vector<8x1xf32> to vector<8x8xf32>
    %41 = arith.subf %37, %40 : vector<8x8xf32>
    %42 = math.exp %41 : vector<8x8xf32>
    %cst_21 = arith.constant dense<0.000000e+00> : vector<8xf32>
    %43 = vector.multi_reduction <add>, %42, %cst_21 [1] : vector<8x8xf32> to vector<8xf32>
    %44 = vector.shape_cast %43 : vector<8xf32> to vector<8x1xf32>
    %45 = tpu.reciprocal %44 : vector<8x1xf32> -> vector<8x1xf32>
    %46 = vector.broadcast %45 : vector<8x1xf32> to vector<8x8xf32>
    %47 = arith.mulf %42, %46 : vector<8x8xf32>
    %cst_22 = arith.constant dense<0.000000e+00> : vector<8x8xf32>
    %48 = tpu.matmul %47, %36, %cst_22 {dimension_numbers = #tpu.dot_dimension_numbers<[1], [0], [0], [1], [0, 0, 1, 1], [], []>} : vector<8x8xf32>, vector<8x8xf32>, vector<8x8xf32> -> vector<8x8xf32>
    %49 = vector.extract_strided_slice %16 {offsets = [0, 16], sizes = [8, 8], strides = [1, 1]} : vector<16x32xf32> to vector<8x8xf32>
    %50 = vector.extract_strided_slice %17 {offsets = [0, 16], sizes = [8, 8], strides = [1, 1]} : vector<16x32xf32> to vector<8x8xf32>
    %51 = vector.extract_strided_slice %18 {offsets = [0, 16], sizes = [8, 8], strides = [1, 1]} : vector<16x32xf32> to vector<8x8xf32>
    %cst_23 = arith.constant dense<0.000000e+00> : vector<8x8xf32>
    %52 = tpu.matmul %49, %50, %cst_23 {dimension_numbers = #tpu.dot_dimension_numbers<[1], [1], [0], [0], [0, 0, 1, 0], [], []>} : vector<8x8xf32>, vector<8x8xf32>, vector<8x8xf32> -> vector<8x8xf32>
    %cst_24 = arith.constant dense<0xFF800000> : vector<8xf32>
    %53 = vector.multi_reduction <maximumf>, %52, %cst_24 [1] : vector<8x8xf32> to vector<8xf32>
    %54 = vector.shape_cast %53 : vector<8xf32> to vector<8x1xf32>
    %55 = vector.broadcast %54 : vector<8x1xf32> to vector<8x8xf32>
    %56 = arith.subf %52, %55 : vector<8x8xf32>
    %57 = math.exp %56 : vector<8x8xf32>
    %cst_25 = arith.constant dense<0.000000e+00> : vector<8xf32>
    %58 = vector.multi_reduction <add>, %57, %cst_25 [1] : vector<8x8xf32> to vector<8xf32>
    %59 = vector.shape_cast %58 : vector<8xf32> to vector<8x1xf32>
    %60 = tpu.reciprocal %59 : vector<8x1xf32> -> vector<8x1xf32>
    %61 = vector.broadcast %60 : vector<8x1xf32> to vector<8x8xf32>
    %62 = arith.mulf %57, %61 : vector<8x8xf32>
    %cst_26 = arith.constant dense<0.000000e+00> : vector<8x8xf32>
    %63 = tpu.matmul %62, %51, %cst_26 {dimension_numbers = #tpu.dot_dimension_numbers<[1], [0], [0], [1], [0, 0, 1, 1], [], []>} : vector<8x8xf32>, vector<8x8xf32>, vector<8x8xf32> -> vector<8x8xf32>
    %64 = vector.extract_strided_slice %16 {offsets = [0, 24], sizes = [8, 8], strides = [1, 1]} : vector<16x32xf32> to vector<8x8xf32>
    %65 = vector.extract_strided_slice %17 {offsets = [0, 24], sizes = [8, 8], strides = [1, 1]} : vector<16x32xf32> to vector<8x8xf32>
    %66 = vector.extract_strided_slice %18 {offsets = [0, 24], sizes = [8, 8], strides = [1, 1]} : vector<16x32xf32> to vector<8x8xf32>
    %cst_27 = arith.constant dense<0.000000e+00> : vector<8x8xf32>
    %67 = tpu.matmul %64, %65, %cst_27 {dimension_numbers = #tpu.dot_dimension_numbers<[1], [1], [0], [0], [0, 0, 1, 0], [], []>} : vector<8x8xf32>, vector<8x8xf32>, vector<8x8xf32> -> vector<8x8xf32>
    %cst_28 = arith.constant dense<0xFF800000> : vector<8xf32>
    %68 = vector.multi_reduction <maximumf>, %67, %cst_28 [1] : vector<8x8xf32> to vector<8xf32>
    %69 = vector.shape_cast %68 : vector<8xf32> to vector<8x1xf32>
    %70 = vector.broadcast %69 : vector<8x1xf32> to vector<8x8xf32>
    %71 = arith.subf %67, %70 : vector<8x8xf32>
    %72 = math.exp %71 : vector<8x8xf32>
    %cst_29 = arith.constant dense<0.000000e+00> : vector<8xf32>
    %73 = vector.multi_reduction <add>, %72, %cst_29 [1] : vector<8x8xf32> to vector<8xf32>
    %74 = vector.shape_cast %73 : vector<8xf32> to vector<8x1xf32>
    %75 = tpu.reciprocal %74 : vector<8x1xf32> -> vector<8x1xf32>
    %76 = vector.broadcast %75 : vector<8x1xf32> to vector<8x8xf32>
    %77 = arith.mulf %72, %76 : vector<8x8xf32>
    %cst_30 = arith.constant dense<0.000000e+00> : vector<8x8xf32>
    %78 = tpu.matmul %77, %66, %cst_30 {dimension_numbers = #tpu.dot_dimension_numbers<[1], [0], [0], [1], [0, 0, 1, 1], [], []>} : vector<8x8xf32>, vector<8x8xf32>, vector<8x8xf32> -> vector<8x8xf32>
    %79 = tpu.concatenate %33, %48, %63, %78 in 1 : vector<8x8xf32>, vector<8x8xf32>, vector<8x8xf32>, vector<8x8xf32> -> vector<8x32xf32>
    %80 = vector.extract_strided_slice %16 {offsets = [8, 0], sizes = [8, 8], strides = [1, 1]} : vector<16x32xf32> to vector<8x8xf32>
    %81 = vector.extract_strided_slice %17 {offsets = [8, 0], sizes = [8, 8], strides = [1, 1]} : vector<16x32xf32> to vector<8x8xf32>
    %82 = vector.extract_strided_slice %18 {offsets = [8, 0], sizes = [8, 8], strides = [1, 1]} : vector<16x32xf32> to vector<8x8xf32>
    %cst_31 = arith.constant dense<0.000000e+00> : vector<8x8xf32>
    %83 = tpu.matmul %80, %81, %cst_31 {dimension_numbers = #tpu.dot_dimension_numbers<[1], [1], [0], [0], [0, 0, 1, 0], [], []>} : vector<8x8xf32>, vector<8x8xf32>, vector<8x8xf32> -> vector<8x8xf32>
    %cst_32 = arith.constant dense<0xFF800000> : vector<8xf32>
    %84 = vector.multi_reduction <maximumf>, %83, %cst_32 [1] : vector<8x8xf32> to vector<8xf32>
    %85 = vector.shape_cast %84 : vector<8xf32> to vector<8x1xf32>
    %86 = vector.broadcast %85 : vector<8x1xf32> to vector<8x8xf32>
    %87 = arith.subf %83, %86 : vector<8x8xf32>
    %88 = math.exp %87 : vector<8x8xf32>
    %cst_33 = arith.constant dense<0.000000e+00> : vector<8xf32>
    %89 = vector.multi_reduction <add>, %88, %cst_33 [1] : vector<8x8xf32> to vector<8xf32>
    %90 = vector.shape_cast %89 : vector<8xf32> to vector<8x1xf32>
    %91 = tpu.reciprocal %90 : vector<8x1xf32> -> vector<8x1xf32>
    %92 = vector.broadcast %91 : vector<8x1xf32> to vector<8x8xf32>
    %93 = arith.mulf %88, %92 : vector<8x8xf32>
    %cst_34 = arith.constant dense<0.000000e+00> : vector<8x8xf32>
    %94 = tpu.matmul %93, %82, %cst_34 {dimension_numbers = #tpu.dot_dimension_numbers<[1], [0], [0], [1], [0, 0, 1, 1], [], []>} : vector<8x8xf32>, vector<8x8xf32>, vector<8x8xf32> -> vector<8x8xf32>
    %95 = vector.extract_strided_slice %16 {offsets = [8, 8], sizes = [8, 8], strides = [1, 1]} : vector<16x32xf32> to vector<8x8xf32>
    %96 = vector.extract_strided_slice %17 {offsets = [8, 8], sizes = [8, 8], strides = [1, 1]} : vector<16x32xf32> to vector<8x8xf32>
    %97 = vector.extract_strided_slice %18 {offsets = [8, 8], sizes = [8, 8], strides = [1, 1]} : vector<16x32xf32> to vector<8x8xf32>
    %cst_35 = arith.constant dense<0.000000e+00> : vector<8x8xf32>
    %98 = tpu.matmul %95, %96, %cst_35 {dimension_numbers = #tpu.dot_dimension_numbers<[1], [1], [0], [0], [0, 0, 1, 0], [], []>} : vector<8x8xf32>, vector<8x8xf32>, vector<8x8xf32> -> vector<8x8xf32>
    %cst_36 = arith.constant dense<0xFF800000> : vector<8xf32>
    %99 = vector.multi_reduction <maximumf>, %98, %cst_36 [1] : vector<8x8xf32> to vector<8xf32>
    %100 = vector.shape_cast %99 : vector<8xf32> to vector<8x1xf32>
    %101 = vector.broadcast %100 : vector<8x1xf32> to vector<8x8xf32>
    %102 = arith.subf %98, %101 : vector<8x8xf32>
    %103 = math.exp %102 : vector<8x8xf32>
    %cst_37 = arith.constant dense<0.000000e+00> : vector<8xf32>
    %104 = vector.multi_reduction <add>, %103, %cst_37 [1] : vector<8x8xf32> to vector<8xf32>
    %105 = vector.shape_cast %104 : vector<8xf32> to vector<8x1xf32>
    %106 = tpu.reciprocal %105 : vector<8x1xf32> -> vector<8x1xf32>
    %107 = vector.broadcast %106 : vector<8x1xf32> to vector<8x8xf32>
    %108 = arith.mulf %103, %107 : vector<8x8xf32>
    %cst_38 = arith.constant dense<0.000000e+00> : vector<8x8xf32>
    %109 = tpu.matmul %108, %97, %cst_38 {dimension_numbers = #tpu.dot_dimension_numbers<[1], [0], [0], [1], [0, 0, 1, 1], [], []>} : vector<8x8xf32>, vector<8x8xf32>, vector<8x8xf32> -> vector<8x8xf32>
    %110 = vector.extract_strided_slice %16 {offsets = [8, 16], sizes = [8, 8], strides = [1, 1]} : vector<16x32xf32> to vector<8x8xf32>
    %111 = vector.extract_strided_slice %17 {offsets = [8, 16], sizes = [8, 8], strides = [1, 1]} : vector<16x32xf32> to vector<8x8xf32>
    %112 = vector.extract_strided_slice %18 {offsets = [8, 16], sizes = [8, 8], strides = [1, 1]} : vector<16x32xf32> to vector<8x8xf32>
    %cst_39 = arith.constant dense<0.000000e+00> : vector<8x8xf32>
    %113 = tpu.matmul %110, %111, %cst_39 {dimension_numbers = #tpu.dot_dimension_numbers<[1], [1], [0], [0], [0, 0, 1, 0], [], []>} : vector<8x8xf32>, vector<8x8xf32>, vector<8x8xf32> -> vector<8x8xf32>
    %cst_40 = arith.constant dense<0xFF800000> : vector<8xf32>
    %114 = vector.multi_reduction <maximumf>, %113, %cst_40 [1] : vector<8x8xf32> to vector<8xf32>
    %115 = vector.shape_cast %114 : vector<8xf32> to vector<8x1xf32>
    %116 = vector.broadcast %115 : vector<8x1xf32> to vector<8x8xf32>
    %117 = arith.subf %113, %116 : vector<8x8xf32>
    %118 = math.exp %117 : vector<8x8xf32>
    %cst_41 = arith.constant dense<0.000000e+00> : vector<8xf32>
    %119 = vector.multi_reduction <add>, %118, %cst_41 [1] : vector<8x8xf32> to vector<8xf32>
    %120 = vector.shape_cast %119 : vector<8xf32> to vector<8x1xf32>
    %121 = tpu.reciprocal %120 : vector<8x1xf32> -> vector<8x1xf32>
    %122 = vector.broadcast %121 : vector<8x1xf32> to vector<8x8xf32>
    %123 = arith.mulf %118, %122 : vector<8x8xf32>
    %cst_42 = arith.constant dense<0.000000e+00> : vector<8x8xf32>
    %124 = tpu.matmul %123, %112, %cst_42 {dimension_numbers = #tpu.dot_dimension_numbers<[1], [0], [0], [1], [0, 0, 1, 1], [], []>} : vector<8x8xf32>, vector<8x8xf32>, vector<8x8xf32> -> vector<8x8xf32>
    %125 = vector.extract_strided_slice %16 {offsets = [8, 24], sizes = [8, 8], strides = [1, 1]} : vector<16x32xf32> to vector<8x8xf32>
    %126 = vector.extract_strided_slice %17 {offsets = [8, 24], sizes = [8, 8], strides = [1, 1]} : vector<16x32xf32> to vector<8x8xf32>
    %127 = vector.extract_strided_slice %18 {offsets = [8, 24], sizes = [8, 8], strides = [1, 1]} : vector<16x32xf32> to vector<8x8xf32>
    %cst_43 = arith.constant dense<0.000000e+00> : vector<8x8xf32>
    %128 = tpu.matmul %125, %126, %cst_43 {dimension_numbers = #tpu.dot_dimension_numbers<[1], [1], [0], [0], [0, 0, 1, 0], [], []>} : vector<8x8xf32>, vector<8x8xf32>, vector<8x8xf32> -> vector<8x8xf32>
    %cst_44 = arith.constant dense<0xFF800000> : vector<8xf32>
    %129 = vector.multi_reduction <maximumf>, %128, %cst_44 [1] : vector<8x8xf32> to vector<8xf32>
    %130 = vector.shape_cast %129 : vector<8xf32> to vector<8x1xf32>
    %131 = vector.broadcast %130 : vector<8x1xf32> to vector<8x8xf32>
    %132 = arith.subf %128, %131 : vector<8x8xf32>
    %133 = math.exp %132 : vector<8x8xf32>
    %cst_45 = arith.constant dense<0.000000e+00> : vector<8xf32>
    %134 = vector.multi_reduction <add>, %133, %cst_45 [1] : vector<8x8xf32> to vector<8xf32>
    %135 = vector.shape_cast %134 : vector<8xf32> to vector<8x1xf32>
    %136 = tpu.reciprocal %135 : vector<8x1xf32> -> vector<8x1xf32>
    %137 = vector.broadcast %136 : vector<8x1xf32> to vector<8x8xf32>
    %138 = arith.mulf %133, %137 : vector<8x8xf32>
    %cst_46 = arith.constant dense<0.000000e+00> : vector<8x8xf32>
    %139 = tpu.matmul %138, %127, %cst_46 {dimension_numbers = #tpu.dot_dimension_numbers<[1], [0], [0], [1], [0, 0, 1, 1], [], []>} : vector<8x8xf32>, vector<8x8xf32>, vector<8x8xf32> -> vector<8x8xf32>
    %140 = tpu.concatenate %94, %109, %124, %139 in 1 : vector<8x8xf32>, vector<8x8xf32>, vector<8x8xf32>, vector<8x8xf32> -> vector<8x32xf32>
    %141 = tpu.concatenate %79, %140 in 0 : vector<8x32xf32>, vector<8x32xf32> -> vector<16x32xf32>
    %cst_47 = arith.constant dense<0.000000e+00> : vector<16x32xf32>
    %142 = tpu.matmul %141, %2, %cst_47 {dimension_numbers = #tpu.dot_dimension_numbers<[1], [0], [0], [1], [0, 0, 1, 1], [], []>} : vector<16x32xf32>, vector<32x32xf32>, vector<16x32xf32> -> vector<16x32xf32>
    %143 = vector.broadcast %6 : vector<1x32xf32> to vector<16x32xf32>
    %144 = arith.addf %142, %143 : vector<16x32xf32>
    %145 = arith.addf %144, %0 : vector<16x32xf32>
    %cst_48 = arith.constant dense<0.000000e+00> : vector<16xf32>
    %146 = vector.multi_reduction <add>, %145, %cst_48 [1] : vector<16x32xf32> to vector<16xf32>
    %147 = vector.shape_cast %146 : vector<16xf32> to vector<16x1xf32>
    %cst_49 = arith.constant 3.200000e+01 : f32
    %148 = vector.broadcast %cst_49 : f32 to vector<16x1xf32>
    %149 = arith.divf %147, %148 : vector<16x1xf32>
    %150 = vector.broadcast %149 : vector<16x1xf32> to vector<16x32xf32>
    %151 = arith.subf %145, %150 : vector<16x32xf32>
    %152 = arith.mulf %151, %151 : vector<16x32xf32>
    %cst_50 = arith.constant dense<0.000000e+00> : vector<16xf32>
    %153 = vector.multi_reduction <add>, %152, %cst_50 [1] : vector<16x32xf32> to vector<16xf32>
    %154 = vector.shape_cast %153 : vector<16xf32> to vector<16x1xf32>
    %cst_51 = arith.constant 3.200000e+01 : f32
    %155 = vector.broadcast %cst_51 : f32 to vector<16x1xf32>
    %156 = arith.divf %154, %155 : vector<16x1xf32>
    %157 = vector.broadcast %149 : vector<16x1xf32> to vector<16x32xf32>
    %158 = arith.subf %145, %157 : vector<16x32xf32>
    %cst_52 = arith.constant 9.99999996E-13 : f32
    %159 = vector.broadcast %cst_52 : f32 to vector<16x1xf32>
    %160 = arith.addf %156, %159 : vector<16x1xf32>
    %161 = math.rsqrt %160 : vector<16x1xf32>
    %162 = vector.broadcast %161 : vector<16x1xf32> to vector<16x32xf32>
    %163 = arith.mulf %158, %162 : vector<16x32xf32>
    %164 = vector.broadcast %7 : vector<1x32xf32> to vector<16x32xf32>
    %165 = arith.mulf %163, %164 : vector<16x32xf32>
    %166 = vector.broadcast %8 : vector<1x32xf32> to vector<16x32xf32>
    %167 = arith.addf %165, %166 : vector<16x32xf32>
    %cst_53 = arith.constant dense<0.000000e+00> : vector<16x64xf32>
    %168 = tpu.matmul %167, %3, %cst_53 {dimension_numbers = #tpu.dot_dimension_numbers<[1], [0], [0], [1], [0, 0, 1, 1], [], []>} : vector<16x32xf32>, vector<32x64xf32>, vector<16x64xf32> -> vector<16x64xf32>
    %169 = vector.broadcast %9 : vector<1x64xf32> to vector<16x64xf32>
    %170 = arith.addf %168, %169 : vector<16x64xf32>
    %cst_54 = arith.constant 5.000000e-01 : f32
    %171 = vector.broadcast %cst_54 : f32 to vector<16x64xf32>
    %172 = arith.mulf %171, %170 : vector<16x64xf32>
    %173 = arith.mulf %170, %170 : vector<16x64xf32>
    %174 = arith.mulf %173, %170 : vector<16x64xf32>
    %cst_55 = arith.constant 4.471500e-02 : f32
    %175 = vector.broadcast %cst_55 : f32 to vector<16x64xf32>
    %176 = arith.mulf %175, %174 : vector<16x64xf32>
    %177 = arith.addf %170, %176 : vector<16x64xf32>
    %cst_56 = arith.constant 0.797884583 : f32
    %178 = vector.broadcast %cst_56 : f32 to vector<16x64xf32>
    %179 = arith.mulf %178, %177 : vector<16x64xf32>
    %180 = math.tanh %179 : vector<16x64xf32>
    %cst_57 = arith.constant 1.000000e+00 : f32
    %181 = vector.broadcast %cst_57 : f32 to vector<16x64xf32>
    %182 = arith.addf %181, %180 : vector<16x64xf32>
    %183 = arith.mulf %172, %182 : vector<16x64xf32>
    %cst_58 = arith.constant dense<0.000000e+00> : vector<16x32xf32>
    %184 = tpu.matmul %183, %4, %cst_58 {dimension_numbers = #tpu.dot_dimension_numbers<[1], [0], [0], [1], [0, 0, 1, 1], [], []>} : vector<16x64xf32>, vector<64x32xf32>, vector<16x32xf32> -> vector<16x32xf32>
    %185 = vector.broadcast %10 : vector<1x32xf32> to vector<16x32xf32>
    %186 = arith.addf %184, %185 : vector<16x32xf32>
    %187 = arith.addf %186, %167 : vector<16x32xf32>
    %cst_59 = arith.constant dense<0.000000e+00> : vector<16xf32>
    %188 = vector.multi_reduction <add>, %187, %cst_59 [1] : vector<16x32xf32> to vector<16xf32>
    %189 = vector.shape_cast %188 : vector<16xf32> to vector<16x1xf32>
    %cst_60 = arith.constant 3.200000e+01 : f32
    %190 = vector.broadcast %cst_60 : f32 to vector<16x1xf32>
    %191 = arith.divf %189, %190 : vector<16x1xf32>
    %192 = vector.broadcast %191 : vector<16x1xf32> to vector<16x32xf32>
    %193 = arith.subf %187, %192 : vector<16x32xf32>
    %194 = arith.mulf %193, %193 : vector<16x32xf32>
    %cst_61 = arith.constant dense<0.000000e+00> : vector<16xf32>
    %195 = vector.multi_reduction <add>, %194, %cst_61 [1] : vector<16x32xf32> to vector<16xf32>
    %196 = vector.shape_cast %195 : vector<16xf32> to vector<16x1xf32>
    %cst_62 = arith.constant 3.200000e+01 : f32
    %197 = vector.broadcast %cst_62 : f32 to vector<16x1xf32>
    %198 = arith.divf %196, %197 : vector<16x1xf32>
    %199 = vector.broadcast %191 : vector<16x1xf32> to vector<16x32xf32>
    %200 = arith.subf %187, %199 : vector<16x32xf32>
    %cst_63 = arith.constant 9.99999996E-13 : f32
    %201 = vector.broadcast %cst_63 : f32 to vector<16x1xf32>
    %202 = arith.addf %198, %201 : vector<16x1xf32>
    %203 = math.rsqrt %202 : vector<16x1xf32>
    %204 = vector.broadcast %203 : vector<16x1xf32> to vector<16x32xf32>
    %205 = arith.mulf %200, %204 : vector<16x32xf32>
    %206 = vector.broadcast %11 : vector<1x32xf32> to vector<16x32xf32>
    %207 = arith.mulf %205, %206 : vector<16x32xf32>
    %208 = vector.broadcast %12 : vector<1x32xf32> to vector<16x32xf32>
    %209 = arith.addf %207, %208 : vector<16x32xf32>
    %cst_64 = arith.constant 0.000000e+00 : f32
    %210 = vector.broadcast %cst_64 : f32 to vector<16x96xf32>
    %211 = tpu.concatenate %209, %210 in 1 : vector<16x32xf32>, vector<16x96xf32> -> vector<16x128xf32>
    %c0_65 = arith.constant 0 : index
    %c0_66 = arith.constant 0 : index
    %212 = vector.load %arg4[%c0_65, %c0_66] : memref<16x128xf32, #tpu.memory_space<vmem>>, vector<16x128xf32>
    tpu.vector_store %arg4[%c0_65, %c0_66], %211 {strides = array<i32>} : memref<16x128xf32, #tpu.memory_space<vmem>>, vector<16x128xf32>,
    %213 = tpu.concatenate %32, %47, %62, %77, %93, %108, %123, %138 in 0 : vector<8x8xf32>, vector<8x8xf32>, vector<8x8xf32>, vector<8x8xf32>, vector<8x8xf32>, vector<8x8xf32>, vector<8x8xf32>, vector<8x8xf32> -> vector<64x8xf32>
    %cst_67 = arith.constant 0.000000e+00 : f32
    %214 = vector.broadcast %cst_67 : f32 to vector<64x120xf32>
    %215 = tpu.concatenate %213, %214 in 1 : vector<64x8xf32>, vector<64x120xf32> -> vector<64x128xf32>
    %c0_68 = arith.constant 0 : index
    %c0_69 = arith.constant 0 : index
    %216 = vector.load %arg5[%c0_68, %c0_69] : memref<64x128xf32, #tpu.memory_space<vmem>>, vector<64x128xf32>
    tpu.vector_store %arg5[%c0_68, %c0_69], %215 {strides = array<i32>} : memref<64x128xf32, #tpu.memory_space<vmem>>, vector<64x128xf32>,
    return
  }
  func.func @transform_0(%arg0: i32) -> (i32, i32) {
    %c0_i32 = arith.constant 0 : i32
    %c0_i32_0 = arith.constant 0 : i32
    %c0_i32_1 = arith.constant 0 : i32
    return %c0_i32, %c0_i32_0 : i32, i32
  }
  func.func @transform_1(%arg0: i32) -> (i32, i32) {
    %c0_i32 = arith.constant 0 : i32
    %c0_i32_0 = arith.constant 0 : i32
    %c0_i32_1 = arith.constant 0 : i32
    return %c0_i32, %c0_i32_0 : i32, i32
  }
  func.func @transform_2(%arg0: i32) -> (i32, i32) {
    %c0_i32 = arith.constant 0 : i32
    %c0_i32_0 = arith.constant 0 : i32
    %c0_i32_1 = arith.constant 0 : i32
    return %c0_i32, %c0_i32_0 : i32, i32
  }
  func.func @transform_3(%arg0: i32) -> (i32, i32) {
    %c0_i32 = arith.constant 0 : i32
    %c0_i32_0 = arith.constant 0 : i32
    %c0_i32_1 = arith.constant 0 : i32
    return %c0_i32, %c0_i32_0 : i32, i32
  }
  func.func @transform_4(%arg0: i32) -> (i32, i32) {
    %c0_i32 = arith.constant 0 : i32
    %c0_i32_0 = arith.constant 0 : i32
    %c0_i32_1 = arith.constant 0 : i32
    return %c0_i32, %c0_i32_0 : i32, i32
  }
}

</mosaic_0001>

<bundles_post_ra>
// kernel: albert_layer_group_forward.1
= control target key start
LH: loop header
LB: loop body
LE: loop exit
PB: predicated region body
PF: predicated region fallthrough
CT: control target
= control target key end

     0   :  { %10 = vsyncpa [#allocation3], 0  ;;  %s2624_s0 = inlined_call_operand.hbm [shape: f32[16,32], index: 0, kind: input, shape index: {}]   ;;  %s2625_s1 = inlined_call_operand.hbm [shape: f32[160,128], index: 1, kind: input, shape index: {}]   ;;  %s2626_s2 = inlined_call_operand.vmem [shape: f32[8,128], index: 2, kind: input, shape index: {}]   ;;  %s2627_s3 = inlined_call_operand.vmem [shape: f32[16,128], index: 3, kind: output, shape index: {0}]   ;;  %s2628_s4 = inlined_call_operand.hbm [shape: f32[64,128], index: 4, kind: output, shape index: {1}]  }
   0x1   :  { %11 = vsyncpa [#allocation6], 0 }
   0x2   :  { %12 = vsyncpa [#allocation4], 0  ;;  %s2317_s15 = smov [#allocation2]   ;;  %s2245_s19 = scalar_lea.hbm %s2624_s0, 256 }
   0x3   :  { %s18_s16 = sshll.u32 %s2317_s15, 4  ;;  %p2246_p0 = scmp.ne.s32.totalorder %s2624_s0, %s2245_s19  ;;  %s19_s16 = int_to_ptr.vmem [resolvable:$true] %s18_s16 }
   0x4   :  { %p2249_p1 = scmp.lt.u32.totalorder %s2245_s19, %s2624_s0 }
   0x6   :  { %p2251_p2 = pnand %p2249_p1, %p2246_p0 }
   0x8   :  { %2254 = shalt.err (!%p2251_p2)
}
   0x9   :  { %s2255_s24 = scalar_lea.vmem %s19_s16, 256  ;;  %p2260_p4 = scmp.lt.s32.totalorder %s19_s16, %s19_s16 }
   0xa   :  { %p2256_p3 = scmp.ne.s32.totalorder %s19_s16, %s2255_s24  ;;  %p2261_p5 = scmp.lt.s32.totalorder %s2255_s24, %s2255_s24 }
   0xc   :  { %p2262_p6 = por %p2261_p5, %p2260_p4 }
   0xe   :  { %p2263_p7 = pnand %p2262_p6, %p2256_p3 }
  0x10   :  { %2266 = shalt.err (!%p2263_p7)
}
  0x11   :  { %s2318_s25 = smov 128   ;;  %s2319_s26 = smov 8  }
  0x12   :  { %24 = dma.hbm_to_vmem [thread:$0]  %s2624_s0, 256, %s19_s16, [#allocation3], %s2318_s25, %s2318_s25, %s2319_s26  }
  0x13   :  { %s2320_s29 = smov [#allocation5]   ;;  %s2267_s7 = scalar_lea.hbm %s2625_s1, 2560 }
  0x14   :  { %s30_s30 = sshll.u32 %s2320_s29, 4  ;;  %p2268_p8 = scmp.ne.s32.totalorder %s2625_s1, %s2267_s7  ;;  %s31_s30 = int_to_ptr.vmem [resolvable:$true] %s30_s30 }
  0x15   :  { %p2271_p9 = scmp.lt.u32.totalorder %s2267_s7, %s2625_s1 }
  0x17   :  { %p2273_p10 = pnand %p2271_p9, %p2268_p8 }
  0x19   :  { %2276 = shalt.err (!%p2273_p10)
}
  0x1a   :  { %s2277_s12 = scalar_lea.vmem %s31_s30, 2560  ;;  %p2282_p12 = scmp.lt.s32.totalorder %s31_s30, %s31_s30 }
  0x1b   :  { %p2278_p11 = scmp.ne.s32.totalorder %s31_s30, %s2277_s12  ;;  %p2283_p13 = scmp.lt.s32.totalorder %s2277_s12, %s2277_s12 }
  0x1d   :  { %p2284_p0 = por %p2283_p13, %p2282_p12 }
  0x1f   :  { %p2285_p1 = pnand %p2284_p0, %p2278_p11 }
  0x21   :  { %2288 = shalt.err (!%p2285_p1)
}
  0x22   :  { %36 = dma.hbm_to_vmem [thread:$0]  %s2625_s1, 2560, %s31_s30, [#allocation6], %s2318_s25, %s2318_s25, %s2319_s26  }
  0x23   :  { %2311 = dma.done.wait [#allocation3], 256  }
  0x24   :  { %2312 = vsyncadd [#allocation3], 4294967040 }
  0x25   :  { %2313 = dma.done.wait [#allocation6], 2560  }
  0x26   :  { %2314 = vsyncadd [#allocation6], 4294964736  ;;  %vm79_vm0 = vcmask 261120   ;;  %v47_v0 = vld [vmem:[#allocation5] sm:$0xff]  ;;  %v48_v1 = vld [vmem:[#allocation5 + $0x8] sm:$0xff]  ;;  %v2321_v8 = vmov 0.0  }
  0x27   :  { %v49_v2 = vld [vmem:[#allocation5 + $0x10] sm:$0xff]  ;;  %v2141_v3 = vpack.c.bf16 %v48_v1, %v47_v0  ;;  %v50_v4 = vld [vmem:[#allocation5 + $0x18] sm:$0xff]  ;;  %2030 = vmatprep.subr.mxu0 %v2321_v8  ;;  %vm2322_vm1 = vmmov 0   ;;  %s2323_s15 = smov 120   ;;  %s2324_s16 = smov 96   ;;  %vm164_vm2 = vcmask 64512  }
  0x28   :  { %v2392_v5 = vld [vmem:[#allocation2] sm:$0xff]  ;;  %v2145_v6 = vpack.c.bf16 %v50_v4, %v49_v2  ;;  %v2396_v7 = vld [vmem:[#allocation2 + $0x8] sm:$0xff]  ;;  %2032 = vmatprep.mubr.msk.f32.mxu0 %vm2322_vm1, %v2321_v8  ;;  %s2325_s17 = smov 80   ;;  %s2326_s18 = smov 88   ;;  %vm834_vm3 = vcmask 130048   ;;  %vm836_vm4 = vcmask 195584  }
  0x29   :  { %2017 = vmatprep.mubr.msk.f32.mxu1 %vm79_vm0, %v2392_v5  ;;  %2142 = vmatprep.subr.bf16.mxu1 %v2141_v3  ;;  %v1909_v9 = vld [vmem:[%s2626_s2] ss:$0 sm:$0xff]  ;;  %s2327_s19 = smov 72   ;;  %s2328_s20 = smov 112   ;;  %vm1745_vm5 = vcmask 523264  }
  0x2a   :  { %2144 = vmatpush3.bf16.msra.mxu1 %v2141_v3  ;;  %s2329_s21 = smov 104   ;;  %s2330_s22 = smov 56  }
  0x2b   :  { %2146 = vmatprep.subr.bf16.mxu1 %v2145_v6  ;;  %s2331_s23 = smov 64   ;;  %s2332_s24 = smov 40  }
  0x2c   :  { %s2333_s27 = smov 48   ;;  %s2334_s28 = smov 16  }
  0x2d   :  { %s2335_s29 = smov 24   ;;  %s2336_s13 = smov [#allocation7]  }
  0x2e   :  { %2148 = vmatpush3.bf16.msra.mxu1 %v2145_v6  ;;  %s1894_s1 = sshll.u32 %s2336_s13, 4  ;;  %s1895_s1 = int_to_ptr.vmem [resolvable:$true] %s1894_s1 }
  0x2f   :  { %2020 = vmatprep.subr.mxu1 %v2321_v8  ;;  %s2289_s14 = scalar_lea.vmem %s1895_s1, 1024  ;;  %p2294_p3 = scmp.lt.s32.totalorder %s1895_s1, %s1895_s1 }
  0x30   :  { %p2290_p2 = scmp.ne.s32.totalorder %s1895_s1, %s2289_s14  ;;  %p2295_p4 = scmp.lt.s32.totalorder %s2289_s14, %s2289_s14 }
  0x31   :  { %2018 = vmatmul.mubr.msk.f32.vlgmr.msra.gmra.mrb[0].mxu1 %vm79_vm0, %v2396_v7 }
  0x32   :  { %2022 = vmatprep.mubr.msk.f32.mxu1 %vm2322_vm1, %v2321_v8  ;;  %p2296_p5 = por %p2295_p4, %p2294_p3 }
  0x34   :  { %p2297_p6 = pnand %p2296_p5, %p2290_p2 }
 0x104   :  { %v2019_v10 = vpop.f32.mrb[0].mxu1 }
 0x105   :  { %v152_v11 = vpop.f32.mrb[1].mxu1  ;;  %v2417_v13 = vadd.f32 %v2019_v10, %v1909_v9 }
 0x106   :  { %v2409_v12 = vadd.f32 %v1909_v9, %v152_v11 }
 0x108   :  { %326 = vrot.lane.b32.xlu1 %v2409_v12, %s2323_s15  ;;  %162 = vrot.lane.b32.xlu0 %v2409_v12, %s2324_s16 }
 0x10c   :  { %493 = vrot.lane.b32.xlu1 %v2409_v12, %s2325_s17  ;;  %328 = vrot.lane.b32.xlu0 %v2409_v12, %s2326_s18 }
 0x110   :  { %658 = vrot.lane.b32.xlu1 %v2409_v12, %s2327_s19  ;;  %491 = vrot.lane.b32.xlu0 %v2409_v12, %s2328_s20 }
 0x114   :  { %839 = vrot.lane.b32.xlu1 %v2417_v13, %s2324_s16  ;;  %656 = vrot.lane.b32.xlu0 %v2409_v12, %s2329_s21 }
 0x118   :  { %1002 = vrot.lane.b32.xlu1 %v2417_v13, %s2323_s15  ;;  %1004 = vrot.lane.b32.xlu0 %v2417_v13, %s2326_s18 }
 0x11c   :  { %1167 = vrot.lane.b32.xlu1 %v2417_v13, %s2328_s20  ;;  %1169 = vrot.lane.b32.xlu0 %v2417_v13, %s2325_s17 }
 0x120   :  { %1332 = vrot.lane.b32.xlu1 %v2417_v13, %s2329_s21  ;;  %1334 = vrot.lane.b32.xlu0 %v2417_v13, %s2327_s19 }
 0x124   :  { %415 = vrot.lane.b32.xlu1 %v2409_v12, %s2330_s22  ;;  %250 = vrot.lane.b32.xlu0 %v2409_v12, %s2331_s23 }
 0x17a   :  { %v327_v14 = vpop.permute.xlu1 %326  ;;  %v163_v15 = vpop.permute.xlu0 %162 }
 0x17b   :  { %2021 = vmatpush3.xpose.msk.msra.mxu1 %vm164_vm2, %v163_v15 }
 0x17c   :  { %2025 = vmatprep.subr.mxu1 %v2321_v8 }
 0x17e   :  { %v494_v16 = vpop.permute.xlu1 %493  ;;  %2023 = vmatmul.mubr.msk.f32.vlgmr.msra.gmra.mrb[2].mxu1 %vm164_vm2, %v2409_v12  ;;  %v329_v17 = vpop.permute.xlu0 %328 }
 0x17f   :  { %2031 = vmatpush3.xpose.msk.msra.mxu0 %vm164_vm2, %v329_v17  ;;  %2027 = vmatprep.mubr.msk.f32.mxu1 %vm2322_vm1, %v2321_v8 }
 0x180   :  { %2040 = vmatprep.subr.mxu0 %v2321_v8 }
 0x182   :  { %v659_v18 = vpop.permute.xlu1 %658  ;;  %2033 = vmatmul.mubr.msk.f32.vlgmr.msra.gmra.mrb[0].mxu0 %vm164_vm2, %v327_v14  ;;  %v492_v19 = vpop.permute.xlu0 %491 }
 0x183   :  { %2041 = vmatpush3.xpose.msk.msra.mxu0 %vm164_vm2, %v494_v16  ;;  %2042 = vmatprep.mubr.msk.f32.mxu0 %vm2322_vm1, %v2321_v8 }
 0x184   :  { %2050 = vmatprep.subr.mxu0 %v2321_v8 }
 0x186   :  { %2043 = vmatmul.mubr.msk.f32.vlgmr.msra.gmra.mrb[2].mxu0 %vm164_vm2, %v492_v19  ;;  %v657_v20 = vpop.permute.xlu0 %656  ;;  %v840_v21 = vpop.permute.xlu1 %839 }
 0x187   :  { %2051 = vmatpush3.xpose.msk.msra.mxu0 %vm164_vm2, %v659_v18  ;;  %2052 = vmatprep.mubr.msk.f32.mxu0 %vm2322_vm1, %v2321_v8 }
 0x188   :  { %2060 = vmatprep.subr.mxu0 %v2321_v8 }
 0x18a   :  { %2053 = vmatmul.mubr.msk.f32.vlgmr.msra.gmra.mrb[4].mxu0 %vm164_vm2, %v657_v20  ;;  %v1005_v22 = vpop.permute.xlu0 %1004  ;;  %v1003_v23 = vpop.permute.xlu1 %1002 }
 0x18b   :  { %2061 = vmatpush3.xpose.msk.msra.mxu0 %vm164_vm2, %v840_v21  ;;  %2062 = vmatprep.mubr.msk.f32.mxu0 %vm2322_vm1, %v2321_v8 }
 0x18c   :  { %2070 = vmatprep.subr.mxu0 %v2321_v8 }
 0x18e   :  { %2063 = vmatmul.mubr.msk.f32.vlgmr.msra.gmra.mrb[6].mxu0 %vm164_vm2, %v2417_v13  ;;  %v1170_v24 = vpop.permute.xlu0 %1169  ;;  %v1168_v26 = vpop.permute.xlu1 %1167 }
 0x18f   :  { %2071 = vmatpush3.xpose.msk.msra.mxu0 %vm164_vm2, %v1005_v22  ;;  %2072 = vmatprep.mubr.msk.f32.mxu0 %vm2322_vm1, %v2321_v8 }
 0x190   :  { %2080 = vmatprep.subr.mxu0 %v2321_v8 }
 0x192   :  { %2073 = vmatmul.mubr.msk.f32.vlgmr.msra.gmra.mrb[8].mxu0 %vm164_vm2, %v1003_v23  ;;  %v1335_v25 = vpop.permute.xlu0 %1334  ;;  %v1333_v28 = vpop.permute.xlu1 %1332 }
 0x193   :  { %2081 = vmatpush3.xpose.msk.msra.mxu0 %vm164_vm2, %v1170_v24  ;;  %2082 = vmatprep.mubr.msk.f32.mxu0 %vm2322_vm1, %v2321_v8 }
 0x194   :  { %2090 = vmatprep.subr.mxu0 %v2321_v8 }
 0x196   :  { %2083 = vmatmul.mubr.msk.f32.vlgmr.msra.gmra.mrb[10].mxu0 %vm164_vm2, %v1168_v26  ;;  %v251_v27 = vpop.permute.xlu0 %250  ;;  %v2483_v53 = vpop.permute.xlu1 %415 }
 0x197   :  { %2026 = vmatpush3.msra.mxu1 %v251_v27  ;;  %2091 = vmatpush3.xpose.msk.msra.mxu0 %vm164_vm2, %v1335_v25 }
 0x198   :  { %2092 = vmatprep.mubr.msk.f32.mxu0 %vm2322_vm1, %v2321_v8  ;;  %2035 = vmatprep.subr.mxu1 %v2321_v8 }
 0x19a   :  { %2093 = vmatmul.mubr.msk.f32.vlgmr.msra.gmra.mrb[12].mxu0 %vm164_vm2, %v1333_v28 }
 0x251   :  { %v235_v29 = vpop.f32.mrb[2].mxu1 }
 0x252   :  { %v2024_v30 = vpop.f32.mrb[3].mxu1  ;;  %v239_v31 = vsel %vm164_vm2, %v235_v29, -inf }
 0x253   :  { %240 = vmax.xlane.f32.xlu0 %v239_v31 }
 0x255   :  { %v400_v32 = vpop.f32.mrb[0].mxu0 }
 0x256   :  { %v2034_v33 = vpop.f32.mrb[1].mxu0  ;;  %v404_v34 = vsel %vm164_vm2, %v400_v32, -inf }
 0x257   :  { %405 = vmax.xlane.f32.xlu1 %v404_v34 }
 0x259   :  { %v565_v35 = vpop.f32.mrb[2].mxu0 }
 0x25a   :  { %v2044_v36 = vpop.f32.mrb[3].mxu0  ;;  %v569_v37 = vsel %vm164_vm2, %v565_v35, -inf }
 0x25b   :  { %570 = vmax.xlane.f32.xlu0 %v569_v37 }
 0x25d   :  { %v730_v38 = vpop.f32.mrb[4].mxu0 }
 0x25e   :  { %v2054_v39 = vpop.f32.mrb[5].mxu0  ;;  %v734_v40 = vsel %vm164_vm2, %v730_v38, -inf }
 0x25f   :  { %735 = vmax.xlane.f32.xlu0 %v734_v40 }
 0x261   :  { %v911_v41 = vpop.f32.mrb[6].mxu0 }
 0x262   :  { %v2064_v42 = vpop.f32.mrb[7].mxu0  ;;  %v915_v43 = vsel %vm164_vm2, %v911_v41, -inf }
 0x263   :  { %916 = vmax.xlane.f32.xlu1 %v915_v43 }
 0x265   :  { %v1076_v44 = vpop.f32.mrb[8].mxu0 }
 0x266   :  { %v2074_v45 = vpop.f32.mrb[9].mxu0  ;;  %v1080_v46 = vsel %vm164_vm2, %v1076_v44, -inf }
 0x267   :  { %1081 = vmax.xlane.f32.xlu0 %v1080_v46 }
 0x269   :  { %v1241_v47 = vpop.f32.mrb[10].mxu0 }
 0x26a   :  { %v2084_v48 = vpop.f32.mrb[11].mxu0  ;;  %v1245_v49 = vsel %vm164_vm2, %v1241_v47, -inf }
 0x26b   :  { %1246 = vmax.xlane.f32.xlu1 %v1245_v49 }
 0x26d   :  { %v1406_v50 = vpop.f32.mrb[12].mxu0 }
 0x26e   :  { %v2094_v51 = vpop.f32.mrb[13].mxu0  ;;  %v1410_v52 = vsel %vm164_vm2, %v1406_v50, -inf }
 0x26f   :  { %1411 = vmax.xlane.f32.xlu0 %v1410_v52 }
 0x27c   :  { %745 = vrot.lane.b32.xlu1 %v2409_v12, %s2332_s24 }
 0x285   :  { %580 = vrot.lane.b32.xlu0 %v2409_v12, %s2333_s27 }
 0x2e0   :  { %v241_v54 = vpop.xlane.xlu0 %240 }
 0x2e1   :  { %v242_v55 = vsub.f32 %v235_v29, %v241_v54 }
 0x2e3   :  { %v243_v56 = vmul.f32 1.442695, %v242_v55 }
 0x2e4   :  { %v406_v57 = vpop.xlane.xlu1 %405 }
 0x2e5   :  { %2201 = vpow2.f32 %v243_v56  ;;  %v407_v58 = vsub.f32 %v400_v32, %v406_v57 }
 0x2e7   :  { %v408_v59 = vmul.f32 1.442695, %v407_v58 }
 0x2e8   :  { %v571_v60 = vpop.xlane.xlu0 %570 }
 0x2e9   :  { %2203 = vpow2.f32 %v408_v59  ;;  %v572_v61 = vsub.f32 %v565_v35, %v571_v60 }
 0x2eb   :  { %v573_v62 = vmul.f32 1.442695, %v572_v61 }
 0x2ec   :  { %v736_v63 = vpop.xlane.xlu0 %735 }
 0x2ed   :  { %2205 = vpow2.f32 %v573_v62  ;;  %v737_v0 = vsub.f32 %v730_v38, %v736_v63 }
 0x2ef   :  { %v2202_v1 = vpop.eup %2201  ;;  %v738_v2 = vmul.f32 1.442695, %v737_v0 }
 0x2f0   :  { %v245_v3 = vsel %vm164_vm2, %v2202_v1, 0.0  ;;  %v917_v14 = vpop.xlane.xlu1 %916 }
 0x2f1   :  { %2207 = vpow2.f32 %v738_v2  ;;  %246 = vadd.xlane.f32.xlu1 %v245_v3  ;;  %v918_v15 = vsub.f32 %v911_v41, %v917_v14 }
 0x2f3   :  { %v2204_v4 = vpop.eup %2203  ;;  %v919_v19 = vmul.f32 1.442695, %v918_v15 }
 0x2f4   :  { %v410_v6 = vsel %vm164_vm2, %v2204_v4, 0.0  ;;  %v1082_v16 = vpop.xlane.xlu0 %1081 }
 0x2f5   :  { %411 = vadd.xlane.f32.xlu0 %v410_v6  ;;  %v1083_v18 = vsub.f32 %v1076_v44, %v1082_v16  ;;  %2209 = vpow2.f32 %v919_v19  ;;  %v51_v19 = vld [vmem:[#allocation5 + $0x20] sm:$0xff] }
 0x2f7   :  { %v2487_v9 = vpop.eup %2205  ;;  %v1084_v22 = vmul.f32 1.442695, %v1083_v18 }
 0x2f8   :  { %v575_v10 = vsel %vm164_vm2, %v2487_v9, 0.0  ;;  %v1247_v17 = vpop.xlane.xlu1 %1246 }
 0x2f9   :  { %576 = vadd.xlane.f32.xlu1 %v575_v10  ;;  %v1248_v20 = vsub.f32 %v1241_v47, %v1247_v17  ;;  %2211 = vpow2.f32 %v1084_v22  ;;  %v54_v22 = vld [vmem:[#allocation5 + $0x38] sm:$0xff] }
 0x2fb   :  { %v2491_v11 = vpop.eup %2207  ;;  %v1249_v23 = vmul.f32 1.442695, %v1248_v20  ;;  %v52_v20 = vld [vmem:[#allocation5 + $0x28] sm:$0xff] }
 0x2fc   :  { %v740_v12 = vsel %vm164_vm2, %v2491_v11, 0.0  ;;  %v1412_v21 = vpop.xlane.xlu0 %1411  ;;  %v746_v34 = vpop.permute.xlu1 %745 }
 0x2fd   :  { %741 = vadd.xlane.f32.xlu0 %v740_v12  ;;  %v1413_v24 = vsub.f32 %v1406_v50, %v1412_v21  ;;  %2213 = vpow2.f32 %v1249_v23  ;;  %v2149_v21 = vpack.c.bf16 %v52_v20, %v51_v19 }
 0x2ff   :  { %v1414_v25 = vmul.f32 1.442695, %v1413_v24  ;;  %v2499_v26 = vpop.eup %2209  ;;  %2150 = vmatprep.subr.bf16.mxu0 %v2149_v21 }
 0x300   :  { %v921_v28 = vsel %vm164_vm2, %v2499_v26, 0.0  ;;  %v581_v35 = vpop.permute.xlu0 %580  ;;  %2152 = vmatpush3.bf16.msra.mxu0 %v2149_v21 }
 0x301   :  { %2215 = vpow2.f32 %v1414_v25 }
 0x303   :  { %v2501_v27 = vpop.eup %2211 }
 0x304   :  { %v1086_v31 = vsel %vm164_vm2, %v2501_v27, 0.0 }
 0x307   :  { %v2505_v29 = vpop.eup %2213 }
 0x308   :  { %v1251_v30 = vsel %vm164_vm2, %v2505_v29, 0.0 }
 0x30a   :  { %1091 = vrot.lane.b32.xlu1 %v2417_v13, %s2330_s22 }
 0x30b   :  { %v2511_v32 = vpop.eup %2215 }
 0x30c   :  { %v1416_v33 = vsel %vm164_vm2, %v2511_v32, 0.0 }
 0x313   :  { %926 = vrot.lane.b32.xlu0 %v2417_v13, %s2331_s23 }
 0x32e   :  { %922 = vadd.xlane.f32.xlu1 %v921_v28 }
 0x332   :  { %1252 = vadd.xlane.f32.xlu1 %v1251_v30  ;;  %1087 = vadd.xlane.f32.xlu0 %v1086_v31 }
 0x336   :  { %1417 = vadd.xlane.f32.xlu1 %v1416_v33 }
 0x347   :  { %1421 = vrot.lane.b32.xlu1 %v2417_v13, %s2332_s24 }
 0x348   :  { %1256 = vrot.lane.b32.xlu0 %v2417_v13, %s2333_s27 }
 0x37e   :  { %v247_v36 = vpop.xlane.xlu1 %246 }
 0x37f   :  { %2217 = vrcp.f32 %v247_v36 }
 0x382   :  { %v412_v37 = vpop.xlane.xlu0 %411 }
 0x383   :  { %2219 = vrcp.f32 %v412_v37 }
 0x386   :  { %v577_v38 = vpop.xlane.xlu1 %576 }
 0x387   :  { %2221 = vrcp.f32 %v577_v38 }
 0x389   :  { %v2218_v39 = vpop.eup %2217 }
 0x38a   :  { %v249_v40 = vmul.f32 %v2218_v39, %v2202_v1  ;;  %v742_v41 = vpop.xlane.xlu0 %741  ;;  %v1092_v52 = vpop.permute.xlu1 %1091 }
 0x38b   :  { %2223 = vrcp.f32 %v742_v41 }
 0x38c   :  { %v1871_v42 = vsel %vm164_vm2, %v249_v40, 0.0  ;;  %2028 = vmatmul.mubr.msk.f32.vlgmr.msra.gmra.mrb[4].mxu1 %vm164_vm2, %v249_v40 }
 0x38d   :  { %v2220_v43 = vpop.eup %2219  ;;  %1879 = vst [vmem:[#allocation7] sm:$0xff] %v1871_v42  ;;  %2036 = vmatpush3.msra.mxu1 %v2483_v53  ;;  %2037 = vmatprep.mubr.msk.f32.mxu1 %vm2322_vm1, %v2321_v8 }
 0x38e   :  { %v414_v13 = vmul.f32 %v2220_v43, %v2204_v4  ;;  %2045 = vmatprep.subr.mxu1 %v2321_v8  ;;  %v927_v51 = vpop.permute.xlu0 %926 }
 0x390   :  { %v1872_v44 = vsel %vm164_vm2, %v414_v13, 0.0  ;;  %2038 = vmatmul.mubr.msk.f32.vlgmr.msra.gmra.mrb[6].mxu1 %vm164_vm2, %v414_v13  ;;  %v1936_v13 = vld [vmem:[%s2626_s2 + $0x1] ss:$0 sm:$0xff] }
 0x391   :  { %v2222_v45 = vpop.eup %2221  ;;  %1880 = vst [vmem:[#allocation7 + $0x8] sm:$0xff] %v1872_v44  ;;  %2046 = vmatpush3.msra.mxu1 %v581_v35  ;;  %2047 = vmatprep.mubr.msk.f32.mxu1 %vm2322_vm1, %v2321_v8 }
 0x392   :  { %v579_v46 = vmul.f32 %v2222_v45, %v2487_v9  ;;  %2055 = vmatprep.subr.mxu1 %v2321_v8 }
 0x394   :  { %v1873_v47 = vsel %vm164_vm2, %v579_v46, 0.0  ;;  %2048 = vmatmul.mubr.msk.f32.vlgmr.msra.gmra.mrb[8].mxu1 %vm164_vm2, %v579_v46 }
 0x395   :  { %v2224_v48 = vpop.eup %2223  ;;  %1881 = vst [vmem:[#allocation7 + $0x10] sm:$0xff] %v1873_v47  ;;  %2056 = vmatpush3.msra.mxu1 %v746_v34  ;;  %2057 = vmatprep.mubr.msk.f32.mxu1 %vm2322_vm1, %v2321_v8 }
 0x396   :  { %v744_v49 = vmul.f32 %v2224_v48, %v2491_v11  ;;  %2065 = vmatprep.subr.mxu1 %v2321_v8 }
 0x398   :  { %v1874_v50 = vsel %vm164_vm2, %v744_v49, 0.0  ;;  %2058 = vmatmul.mubr.msk.f32.vlgmr.msra.gmra.mrb[10].mxu1 %vm164_vm2, %v744_v49 }
 0x399   :  { %1882 = vst [vmem:[#allocation7 + $0x18] sm:$0xff] %v1874_v50  ;;  %2066 = vmatpush3.msra.mxu1 %v927_v51  ;;  %2067 = vmatprep.mubr.msk.f32.mxu1 %vm2322_vm1, %v2321_v8 }
 0x39a   :  { %2075 = vmatprep.subr.mxu1 %v2321_v8 }
 0x3bb   :  { %v923_v53 = vpop.xlane.xlu1 %922 }
 0x3bc   :  { %2225 = vrcp.f32 %v923_v53 }
 0x3bf   :  { %v1253_v54 = vpop.xlane.xlu1 %1252  ;;  %v1088_v55 = vpop.xlane.xlu0 %1087 }
 0x3c0   :  { %2227 = vrcp.f32 %v1253_v54 }
 0x3c1   :  { %2229 = vrcp.f32 %v1088_v55 }
 0x3c3   :  { %v1418_v56 = vpop.xlane.xlu1 %1417  ;;  %v1257_v3 = vpop.permute.xlu0 %1256 }
 0x3c4   :  { %2231 = vrcp.f32 %v1418_v56 }
 0x3c6   :  { %v2226_v57 = vpop.eup %2225 }
 0x3c7   :  { %v925_v58 = vmul.f32 %v2226_v57, %v2499_v26  ;;  %v1422_v9 = vpop.permute.xlu1 %1421 }
 0x3c9   :  { %v1875_v59 = vsel %vm164_vm2, %v925_v58, 0.0  ;;  %2068 = vmatmul.mubr.msk.f32.vlgmr.msra.gmra.mrb[12].mxu1 %vm164_vm2, %v925_v58 }
 0x3ca   :  { %v2228_v60 = vpop.eup %2227  ;;  %1883 = vst [vmem:[#allocation7 + $0x20] sm:$0xff] %v1875_v59  ;;  %2076 = vmatpush3.msra.mxu1 %v1092_v52  ;;  %2077 = vmatprep.mubr.msk.f32.mxu1 %vm2322_vm1, %v2321_v8 }
 0x3cb   :  { %v2230_v61 = vpop.eup %2229  ;;  %v1255_v62 = vmul.f32 %v2228_v60, %v2505_v29  ;;  %2085 = vmatprep.subr.mxu1 %v2321_v8 }
 0x3cc   :  { %v1090_v63 = vmul.f32 %v2230_v61, %v2501_v27  ;;  %v56_v61 = vld [vmem:[#allocation5 + $0x48] sm:$0xff] }
 0x3cd   :  { %v1877_v0 = vsel %vm164_vm2, %v1255_v62, 0.0 }
 0x3ce   :  { %v2232_v1 = vpop.eup %2231  ;;  %1885 = vst [vmem:[#allocation7 + $0x30] sm:$0xff] %v1877_v0  ;;  %v1876_v2 = vsel %vm164_vm2, %v1090_v63, 0.0  ;;  %2078 = vmatmul.mubr.msk.f32.vlgmr.msra.gmra.mrb[14].mxu1 %vm164_vm2, %v1090_v63  ;;  %v57_v63 = vld [vmem:[#allocation5 + $0x50] sm:$0xff]  ;;  %v58_v0 = vld [vmem:[#allocation5 + $0x58] sm:$0xff] }
 0x3cf   :  { %1884 = vst [vmem:[#allocation7 + $0x28] sm:$0xff] %v1876_v2  ;;  %v1420_v4 = vmul.f32 %v2232_v1, %v2511_v32  ;;  %2086 = vmatpush3.msra.mxu1 %v1257_v3  ;;  %2087 = vmatprep.mubr.msk.f32.mxu1 %vm2322_vm1, %v2321_v8  ;;  %v2161_v1 = vpack.c.bf16 %v58_v0, %v57_v63 }
 0x3d0   :  { %2095 = vmatprep.subr.mxu1 %v2321_v8 }
 0x3d1   :  { %v1878_v6 = vsel %vm164_vm2, %v1420_v4, 0.0 }
 0x3d2   :  { %1886 = vst [vmem:[#allocation7 + $0x38] sm:$0xff] %v1878_v6  ;;  %2088 = vmatmul.mubr.msk.f32.vlgmr.msra.gmra.mrb[16].mxu1 %vm164_vm2, %v1255_v62 }
 0x3d3   :  { %2096 = vmatpush3.msra.mxu1 %v1422_v9  ;;  %2097 = vmatprep.mubr.msk.f32.mxu1 %vm2322_vm1, %v2321_v8  ;;  %v53_v8 = vld [vmem:[#allocation5 + $0x30] sm:$0xff] }
 0x3d4   :  { %v2153_v23 = vpack.c.bf16 %v54_v22, %v53_v8  ;;  %v59_v8 = vld [vmem:[#allocation5 + $0x60] sm:$0xff]  ;;  %v60_v22 = vld [vmem:[#allocation5 + $0x68] sm:$0xff] }
 0x3d6   :  { %2098 = vmatmul.mubr.msk.f32.vlgmr.msra.gmra.mrb[18].mxu1 %vm164_vm2, %v1420_v4  ;;  %2154 = vmatprep.subr.bf16.mxu0 %v2153_v23 }
 0x3d7   :  { %2156 = vmatpush3.bf16.msra.mxu0 %v2153_v23  ;;  %v2165_v23 = vpack.c.bf16 %v60_v22, %v59_v8 }
 0x3d9   :  { %2166 = vmatprep.subr.bf16.mxu0 %v2165_v23 }
 0x45f   :  { %v322_v10 = vpop.f32.mrb[4].mxu1 }
 0x460   :  { %v2029_v11 = vpop.f32.mrb[5].mxu1 }
 0x463   :  { %v487_v12 = vpop.f32.mrb[6].mxu1 }
 0x464   :  { %822 = vrot.lane.b32.xlu0 %v487_v12, %s2319_s26  ;;  %v2039_v14 = vpop.f32.mrb[7].mxu1  ;;  %v1939_v12 = vld [vmem:[%s2626_s2 + $0x2] ss:$0 sm:$0xff] }
 0x467   :  { %v652_v15 = vpop.f32.mrb[8].mxu1 }
 0x468   :  { %826 = vrot.lane.b32.xlu1 %v652_v15, %s2334_s28  ;;  %v2049_v16 = vpop.f32.mrb[9].mxu1  ;;  %v1940_v15 = vld [vmem:[%s2626_s2 + $0x3] ss:$0 sm:$0xff] }
 0x46b   :  { %v817_v17 = vpop.f32.mrb[10].mxu1 }
 0x46c   :  { %830 = vrot.lane.b32.xlu1 %v817_v17, %s2335_s29  ;;  %v2059_v18 = vpop.f32.mrb[11].mxu1 }
 0x49c   :  { %v998_v24 = vpop.f32.mrb[12].mxu1 }
 0x49d   :  { %v2069_v25 = vpop.f32.mrb[13].mxu1 }
 0x49e   :  { %v62_v25 = vld [vmem:[#allocation5 + $0x78] sm:$0xff] }
 0x4a1   :  { %v1163_v26 = vpop.f32.mrb[14].mxu1 }
 0x4a2   :  { %1498 = vrot.lane.b32.xlu0 %v1163_v26, %s2319_s26  ;;  %v2079_v27 = vpop.f32.mrb[15].mxu1 }
 0x4a3   :  { %v63_v27 = vld [vmem:[#allocation5 + $0x80] sm:$0xff] }
 0x4a5   :  { %v1328_v28 = vpop.f32.mrb[16].mxu1 }
 0x4a6   :  { %1502 = vrot.lane.b32.xlu0 %v1328_v28, %s2334_s28  ;;  %v2089_v29 = vpop.f32.mrb[17].mxu1  ;;  %v64_v28 = vld [vmem:[#allocation5 + $0x88] sm:$0xff] }
 0x4a7   :  { %v2173_v29 = vpack.c.bf16 %v64_v28, %v63_v27 }
 0x4a9   :  { %v1493_v30 = vpop.f32.mrb[18].mxu1 }
 0x4aa   :  { %1506 = vrot.lane.b32.xlu1 %v1493_v30, %s2335_s29  ;;  %v2099_v31 = vpop.f32.mrb[19].mxu1  ;;  %v65_v30 = vld [vmem:[#allocation5 + $0x90] sm:$0xff] }
 0x4ab   :  { %v66_v31 = vld [vmem:[#allocation5 + $0x98] sm:$0xff] }
 0x4d6   :  { %v823_v32 = vpop.permute.xlu0 %822 }
 0x4d7   :  { %v833_v34 = vsel %vm164_vm2, %v322_v10, %v823_v32  ;;  %v2177_v32 = vpack.c.bf16 %v66_v31, %v65_v30 }
 0x4da   :  { %v827_v33 = vpop.permute.xlu1 %826 }
 0x4db   :  { %v835_v35 = vsel %vm834_vm3, %v833_v34, %v827_v33  ;;  %v1941_v33 = vld [vmem:[%s2626_s2 + $0x4] ss:$0 sm:$0xff] }
 0x4de   :  { %v831_v36 = vpop.permute.xlu1 %830 }
 0x4df   :  { %v837_v37 = vsel %vm836_vm4, %v835_v35, %v831_v36 }
 0x4e0   :  { %2108 = vmatprep.mubr.msk.f32.mxu0 %vm79_vm0, %v837_v37 }
 0x514   :  { %v1499_v38 = vpop.permute.xlu0 %1498 }
 0x515   :  { %v1509_v40 = vsel %vm164_vm2, %v998_v24, %v1499_v38  ;;  %v61_v24 = vld [vmem:[#allocation5 + $0x70] sm:$0xff] }
 0x516   :  { %v2169_v26 = vpack.c.bf16 %v62_v25, %v61_v24 }
 0x518   :  { %v1503_v39 = vpop.permute.xlu0 %1502 }
 0x519   :  { %v1510_v41 = vsel %vm834_vm3, %v1509_v40, %v1503_v39 }
 0x51c   :  { %v1507_v42 = vpop.permute.xlu1 %1506 }
 0x51d   :  { %v1511_v43 = vsel %vm836_vm4, %v1510_v41, %v1507_v42 }
 0x51e   :  { %2109 = vmatmul.mubr.msk.f32.vlgmr.msra.gmra.mrb[14].mxu0 %vm79_vm0, %v1511_v43 }
 0x51f   :  { %2168 = vmatpush3.bf16.msra.mxu0 %v2165_v23 }
 0x520   :  { %2170 = vmatprep.subr.bf16.mxu0 %v2169_v26 }
 0x523   :  { %2172 = vmatpush3.bf16.msra.mxu0 %v2169_v26 }
 0x524   :  { %2174 = vmatprep.subr.bf16.mxu0 %v2173_v29 }
 0x527   :  { %2176 = vmatpush3.bf16.msra.mxu0 %v2173_v29 }
 0x528   :  { %2178 = vmatprep.subr.bf16.mxu0 %v2177_v32 }
 0x52b   :  { %2180 = vmatpush3.bf16.msra.mxu0 %v2177_v32 }
 0x5f1   :  { %v2110_v44 = vpop.f32.mrb[14].mxu0 }
 0x5f2   :  { %v1594_v45 = vadd.f32 %v2110_v44, %v1936_v13  ;;  %v1588_v46 = vpop.f32.mrb[15].mxu0 }
 0x5f3   :  { %v1589_v47 = vadd.f32 %v1936_v13, %v1588_v46 }
 0x5f4   :  { %v1598_v48 = vadd.f32 %v1594_v45, %v2396_v7 }
 0x5f5   :  { %v1597_v49 = vadd.f32 %v1589_v47, %v2392_v5  ;;  %v55_v5 = vld [vmem:[#allocation5 + $0x40] sm:$0xff] }
 0x5f6   :  { %v1602_v50 = vsel %vm79_vm0, %v1598_v48, 0.0  ;;  %v2157_v62 = vpack.c.bf16 %v56_v61, %v55_v5 }
 0x5f7   :  { %1603 = vadd.xlane.f32.xlu1 %v1602_v50  ;;  %v1599_v51 = vsel %vm79_vm0, %v1597_v49, 0.0 }
 0x5f8   :  { %1600 = vadd.xlane.f32.xlu0 %v1599_v51  ;;  %2158 = vmatprep.subr.bf16.mxu1 %v2157_v62 }
 0x5f9   :  { %2160 = vmatpush3.bf16.msra.mxu1 %v2157_v62 }
 0x5fa   :  { %2162 = vmatprep.subr.bf16.mxu1 %v2161_v1 }
 0x5fd   :  { %2164 = vmatpush3.bf16.msra.mxu1 %v2161_v1 }
 0x684   :  { %v1604_v52 = vpop.xlane.xlu1 %1603 }
 0x685   :  { %v1607_v53 = vmul.f32 0.03125, %v1604_v52  ;;  %v1601_v54 = vpop.xlane.xlu0 %1600 }
 0x686   :  { %v1606_v55 = vmul.f32 0.03125, %v1601_v54 }
 0x687   :  { %v1609_v56 = vsub.f32 %v1598_v48, %v1607_v53 }
 0x688   :  { %v1608_v57 = vsub.f32 %v1597_v49, %v1606_v55  ;;  %v1944_v55 = vld [vmem:[%s2626_s2 + $0x5] ss:$0 sm:$0xff] }
 0x689   :  { %v1611_v60 = vmul.f32 %v1609_v56, %v1609_v56 }
 0x68a   :  { %v1610_v58 = vmul.f32 %v1608_v57, %v1608_v57 }
 0x68b   :  { %v1615_v7 = vsel %vm79_vm0, %v1611_v60, 0.0 }
 0x68c   :  { %v1612_v59 = vsel %vm79_vm0, %v1610_v58, 0.0 }
 0x68d   :  { %1613 = vadd.xlane.f32.xlu0 %v1612_v59 }
 0x691   :  { %1616 = vadd.xlane.f32.xlu0 %v1615_v7 }
 0x71a   :  { %v1614_v2 = vpop.xlane.xlu0 %1613 }
 0x71b   :  { %v1618_v3 = vmul.f32 0.03125, %v1614_v2 }
 0x71d   :  { %v1620_v4 = vadd.f32 1e-12, %v1618_v3 }
 0x71e   :  { %v1617_v6 = vpop.xlane.xlu0 %1616 }
 0x71f   :  { %2233 = vrsqrt.f32 %v1620_v4  ;;  %v1619_v9 = vmul.f32 0.03125, %v1617_v6 }
 0x721   :  { %v1621_v10 = vadd.f32 1e-12, %v1619_v9 }
 0x723   :  { %2235 = vrsqrt.f32 %v1621_v10 }
 0x729   :  { %v2234_v11 = vpop.eup %2233 }
 0x72a   :  { %v1624_v14 = vmul.f32 %v2234_v11, %v1608_v57 }
 0x72c   :  { %v1630_v16 = vmul.f32 %v1939_v12, %v1624_v14 }
 0x72d   :  { %v2236_v17 = vpop.eup %2235 }
 0x72e   :  { %v1625_v18 = vmul.f32 %v2236_v17, %v1609_v56  ;;  %v1636_v19 = vadd.f32 %v1940_v15, %v1630_v16 }
 0x730   :  { %v1631_v20 = vmul.f32 %v1939_v12, %v1625_v18  ;;  %2119 = vmatprep.mubr.msk.f32.mxu1 %vm79_vm0, %v1636_v19 }
 0x732   :  { %v1637_v21 = vadd.f32 %v1940_v15, %v1631_v20 }
 0x734   :  { %2120 = vmatmul.mubr.msk.f32.vlgmr.msra.gmra.mrb[20].mxu1 %vm79_vm0, %v1637_v21 }
 0x807   :  { %v2121_v34 = vpop.f32.mrb[20].mxu1 }
 0x808   :  { %v1720_v35 = vadd.f32 %v2121_v34, %v1941_v33  ;;  %v1714_v36 = vpop.f32.mrb[21].mxu1 }
 0x809   :  { %v1715_v37 = vadd.f32 %v1941_v33, %v1714_v36 }
 0x80a   :  { %v1726_v38 = vmul.f32 %v1720_v35, %v1720_v35  ;;  %v1724_v52 = vmul.f32 0.5, %v1720_v35 }
 0x80b   :  { %v1725_v39 = vmul.f32 %v1715_v37, %v1715_v37  ;;  %v1723_v50 = vmul.f32 0.5, %v1715_v37 }
 0x80c   :  { %v1728_v40 = vmul.f32 %v1726_v38, %v1720_v35 }
 0x80d   :  { %v1727_v41 = vmul.f32 %v1725_v39, %v1715_v37 }
 0x80e   :  { %v1730_v42 = vmul.f32 0.044715, %v1728_v40 }
 0x80f   :  { %v1729_v43 = vmul.f32 0.044715, %v1727_v41 }
 0x810   :  { %v1732_v13 = vadd.f32 %v1730_v42, %v1720_v35 }
 0x811   :  { %v1731_v44 = vadd.f32 %v1729_v43, %v1715_v37 }
 0x812   :  { %v1734_v45 = vmul.f32 0.7978846, %v1732_v13 }
 0x813   :  { %v1733_v46 = vmul.f32 0.7978846, %v1731_v44 }
 0x814   :  { %2237 = vtanh.f32 %v1734_v45 }
 0x815   :  { %2239 = vtanh.f32 %v1733_v46 }
 0x81e   :  { %v2238_v47 = vpop.eup %2237 }
 0x81f   :  { %v2240_v48 = vpop.eup %2239  ;;  %v1738_v49 = vadd.f32 1.0, %v2238_v47 }
 0x820   :  { %v1737_v51 = vadd.f32 1.0, %v2240_v48 }
 0x821   :  { %v1740_v54 = vmul.f32 %v1738_v49, %v1724_v52 }
 0x822   :  { %v1739_v53 = vmul.f32 %v1737_v51, %v1723_v50 }
 0x824   :  { %2138 = vmatprep.mubr.msk.f32.mxu0 %vm1745_vm5, %v1739_v53 }
 0x825   :  { %2139 = vmatmul.mubr.msk.f32.vlgmr.msra.gmra.mrb[16].mxu0 %vm1745_vm5, %v1740_v54 }
 0x8f8   :  { %v2140_v56 = vpop.f32.mrb[16].mxu0 }
 0x8f9   :  { %v1824_v57 = vadd.f32 %v2140_v56, %v1944_v55  ;;  %v1818_v58 = vpop.f32.mrb[17].mxu0 }
 0x8fa   :  { %v1819_v59 = vadd.f32 %v1944_v55, %v1818_v58 }
 0x8fb   :  { %v1828_v60 = vadd.f32 %v1824_v57, %v1637_v21 }
 0x8fc   :  { %v1827_v7 = vadd.f32 %v1819_v59, %v1636_v19 }
 0x8fd   :  { %v1832_v5 = vsel %vm79_vm0, %v1828_v60, 0.0 }
 0x8fe   :  { %1833 = vadd.xlane.f32.xlu0 %v1832_v5  ;;  %v1829_v61 = vsel %vm79_vm0, %v1827_v7, 0.0 }
 0x8ff   :  { %1830 = vadd.xlane.f32.xlu1 %v1829_v61 }
 0x98b   :  { %v1834_v62 = vpop.xlane.xlu0 %1833 }
 0x98c   :  { %v1836_v63 = vmul.f32 0.03125, %v1834_v62  ;;  %v1831_v0 = vpop.xlane.xlu1 %1830 }
 0x98d   :  { %v1835_v1 = vmul.f32 0.03125, %v1831_v0 }
 0x98e   :  { %v1838_v2 = vsub.f32 %v1828_v60, %v1836_v63 }
 0x98f   :  { %v1837_v3 = vsub.f32 %v1827_v7, %v1835_v1 }
 0x990   :  { %v1840_v4 = vmul.f32 %v1838_v2, %v1838_v2 }
 0x991   :  { %v1839_v6 = vmul.f32 %v1837_v3, %v1837_v3 }
 0x992   :  { %v1844_v9 = vsel %vm79_vm0, %v1840_v4, 0.0 }
 0x993   :  { %1845 = vadd.xlane.f32.xlu0 %v1844_v9  ;;  %v1841_v10 = vsel %vm79_vm0, %v1839_v6, 0.0 }
 0x994   :  { %1842 = vadd.xlane.f32.xlu1 %v1841_v10 }
 0x995   :  { %2300 = shalt.err (!%p2297_p6)
}
 0x996   :  { %s2301_s17 = scalar_lea.hbm %s2628_s4, 1024 }
 0x997   :  { %p2302_p7 = scmp.ne.s32.totalorder %s2628_s4, %s2301_s17  ;;  %p2305_p8 = scmp.lt.u32.totalorder %s2301_s17, %s2628_s4 }
 0x999   :  { %p2307_p9 = pnand %p2305_p8, %p2302_p7 }
 0x99b   :  { %2310 = shalt.err (!%p2307_p9)
}
 0x99c   :  { %1900 = dma.vmem_to_hbm [thread:$0]  %s1895_s1, 1024, %s2628_s4, [#allocation4], %s2318_s25, %s2318_s25, %s2319_s26  }
 0x99d   :  { %v1947_v19 = vld [vmem:[%s2626_s2 + $0x6] ss:$0 sm:$0xff]  ;;  %v1948_v8 = vld [vmem:[%s2626_s2 + $0x7] ss:$0 sm:$0xff] }
 0xa20   :  { %v1846_v11 = vpop.xlane.xlu0 %1845 }
 0xa21   :  { %v1848_v12 = vmul.f32 0.03125, %v1846_v11  ;;  %v1843_v14 = vpop.xlane.xlu1 %1842 }
 0xa22   :  { %v1847_v15 = vmul.f32 0.03125, %v1843_v14 }
 0xa23   :  { %v1850_v16 = vadd.f32 1e-12, %v1848_v12 }
 0xa24   :  { %v1849_v17 = vadd.f32 1e-12, %v1847_v15 }
 0xa25   :  { %2241 = vrsqrt.f32 %v1850_v16 }
 0xa26   :  { %2243 = vrsqrt.f32 %v1849_v17 }
 0xa2f   :  { %v2242_v18 = vpop.eup %2241 }
 0xa30   :  { %v2244_v20 = vpop.eup %2243  ;;  %v1854_v21 = vmul.f32 %v2242_v18, %v1838_v2 }
 0xa31   :  { %v1853_v22 = vmul.f32 %v2244_v20, %v1837_v3 }
 0xa32   :  { %v1860_v23 = vmul.f32 %v1947_v19, %v1854_v21 }
 0xa33   :  { %v1859_v24 = vmul.f32 %v1947_v19, %v1853_v22 }
 0xa34   :  { %v1866_v25 = vadd.f32 %v1948_v8, %v1860_v23 }
 0xa35   :  { %v1865_v26 = vadd.f32 %v1948_v8, %v1859_v24 }
 0xa36   :  { %v1868_v27 = vsel %vm79_vm0, %v1866_v25, 0.0 }
 0xa37   :  { %1870 = vst [vmem:[%s2627_s3 + $0x8] sm:$0xff] %v1868_v27  ;;  %v1867_v28 = vsel %vm79_vm0, %v1865_v26, 0.0 }
 0xa38   :  { %1869 = vst [vmem:[%s2627_s3] sm:$0xff] %v1867_v28 }
 0xa39   :  { %2315 = dma.done.wait [#allocation4], 1024  }
 0xa3a   :  { %2316 = vsyncadd [#allocation4], 4294966272 }
 0xa3b   :  { %1906 = vsyncpa [#allocation3], 1 }
 0xa3c   :  { %1907 = vsyncpa [#allocation6], 1 }
 0xa3d   :  { %1908 = vsyncpa [#allocation4], 1 }

</bundles_post_ra>
